<compile_context>
chip_gen: v6e
topology: v6e:2x2x1
jax: 0.10.0
libtpu: 0.0.40
codegen_flags: <defaults>
</compile_context>

<pallas_src>
import functools

import jax
import jax.numpy as jnp
import numpy as np
from jax.experimental import pallas as pl
from jax.experimental.pallas import tpu as pltpu


# -----------------------------------------------------------------------------
# Fused Pallas kernel: n_layers LSTM + FC head, single invocation.
# -----------------------------------------------------------------------------
def _decoder_kernel(n_layers, hid_dim, batch, seq, *refs):
    """Ref layout (all full-array VMEM blocks):

      refs[0]                    : x2d      (T*B, Din)   time-major rows
      refs[1 : 1+3L]             : per layer (w_ih_T (Din,4H), w_hh_T (H,4H), b (1,4H))
      refs[1+3L : 5+3L]          : h0 (L,B,H), c0 (L,B,H), fc_w_T (H,O), fc_b (1,O)
      refs[5+3L : 8+3L]          : out2d (T*B,O), hT (L,B,H), cT (L,B,H)
    """
    H, B, T = hid_dim, batch, seq

    x_ref = refs[0]
    lstm_refs = refs[1:1 + 3 * n_layers]
    h0_ref, c0_ref, fcw_ref, fcb_ref = refs[1 + 3 * n_layers:5 + 3 * n_layers]
    out_ref, hT_ref, cT_ref = refs[5 + 3 * n_layers:]

    layer_in = x_ref[...]                              # (T*B, Din)

    for l in range(n_layers):
        w_ih = lstm_refs[3 * l][...]                   # (Din, 4H)
        w_hh = lstm_refs[3 * l + 1][...]               # (H, 4H)
        b = lstm_refs[3 * l + 2][...]                  # (1, 4H)

        # Batched non-recurrent projection for the whole sequence: one MXU
        # pass with T*B rows instead of T tiny B-row matmuls; bias broadcast
        # hoisted out of the recurrence.
        gx = jnp.dot(layer_in, w_ih,
                     preferred_element_type=jnp.float32) + b      # (T*B, 4H)

        h = h0_ref[l]                                  # (B, H)
        c = c0_ref[l]                                  # (B, H)
        hs = []
        for t in range(T):                             # sequential recurrence
            gates = gx[t * B:(t + 1) * B, :] + jnp.dot(
                h, w_hh, preferred_element_type=jnp.float32)      # (B, 4H)
            sg = jax.nn.sigmoid(gates)                 # whole-vreg EUP ops,
            tg = jnp.tanh(gates)                       # slice afterwards
            i_g = sg[:, 0 * H:1 * H]
            f_g = sg[:, 1 * H:2 * H]
            g_g = tg[:, 2 * H:3 * H]
            o_g = sg[:, 3 * H:4 * H]
            c = f_g * c + i_g * g_g
            h = o_g * jnp.tanh(c)
            hs.append(h)

        hT_ref[l] = h                                  # final state, direct write
        cT_ref[l] = c
        layer_in = jnp.concatenate(hs, axis=0)         # (T*B, H), stays in VMEM
        # TODO(synk): inter-layer dropout (train-mode only) not applied.

    # FC head over the whole sequence in one matmul.
    y = jnp.dot(layer_in, fcw_ref[...],
                preferred_element_type=jnp.float32) + fcb_ref[...]
    out_ref[...] = y


# -----------------------------------------------------------------------------
# Wrapper
# -----------------------------------------------------------------------------
@jax.jit
def abp_decoder_forward(x, h_n, c_n, params):
    """x: (B, T, output_dim), h_n/c_n: (n_layers, B, hid_dim).

    Returns (out (B, T, output_dim), (h_n, c_n)) matching ABPDecoder.forward.
    """
    B, T, D = x.shape
    L, _, H = h_n.shape
    O = params["fc_w_T"].shape[-1]

    # Time-major 2D view for the kernel (tiny, fused into the same jit).
    x2d = jnp.transpose(x, (1, 0, 2)).reshape(T * B, D)

    lstm_flat = []
    for (w_ih_T, w_hh_T, b) in params["lstm"]:
        lstm_flat += [w_ih_T, w_hh_T, b]

    def full(shape):
        return pl.BlockSpec(shape, lambda i, _s=shape: (0,) * len(_s))

    in_specs = [full((T * B, D))]
    for l in range(L):
        din = D if l == 0 else H
        in_specs += [full((din, 4 * H)), full((H, 4 * H)), full((1, 4 * H))]
    in_specs += [full((L, B, H)), full((L, B, H)), full((H, O)), full((1, O))]

    out_specs = [full((T * B, O)), full((L, B, H)), full((L, B, H))]
    out_shapes = (
        jax.ShapeDtypeStruct((T * B, O), jnp.float32),
        jax.ShapeDtypeStruct((L, B, H), jnp.float32),
        jax.ShapeDtypeStruct((L, B, H), jnp.float32),
    )

    kernel = functools.partial(_decoder_kernel, L, H, B, T)

    y2d, hT, cT = pl.pallas_call(
        kernel,
        out_shape=out_shapes,
        grid=(1,),
        in_specs=in_specs,
        out_specs=out_specs,
        compiler_params=pltpu.CompilerParams(
            dimension_semantics=("arbitrary",)),
    )(x2d, *lstm_flat, h_n, c_n, params["fc_w_T"], params["fc_b"])

    out = jnp.transpose(y2d.reshape(T, B, O), (1, 0, 2))   # back to (B, T, O)
    return out, (hT, cT)


# -----------------------------------------------------------------------------
# Pure-JAX reference (for correctness check)
# -----------------------------------------------------------------------------
def abp_decoder_ref(x, h_n, c_n, params):
    B, T, D = x.shape
    L, _, H = h_n.shape
    layer_in = x
    hs, cs = [], []
    for l in range(L):
        w_ih_T, w_hh_T, b = params["lstm"][l]

        def step(carry, x_t):
            h, c = carry
            gates = x_t @ w_ih_T + h @ w_hh_T + b
            i = jax.nn.sigmoid(gates[:, 0 * H:1 * H])
            f = jax.nn.sigmoid(gates[:, 1 * H:2 * H])
            g = jnp.tanh(gates[:, 2 * H:3 * H])
            o = jax.nn.sigmoid(gates[:, 3 * H:4 * H])
            c_new = f * c + i * g
            h_new = o * jnp.tanh(c_new)
            return (h_new, c_new), h_new

        (hT, cT), out_tm = jax.lax.scan(
            step, (h_n[l], c_n[l]), jnp.transpose(layer_in, (1, 0, 2)))
        layer_in = jnp.transpose(out_tm, (1, 0, 2))
        hs.append(hT)
        cs.append(cT)
    y = layer_in @ params["fc_w_T"] + params["fc_b"]
    return y, (jnp.stack(hs), jnp.stack(cs))


# -----------------------------------------------------------------------------
# Deterministic parameter construction (PyTorch-style uniform init)
# -----------------------------------------------------------------------------
def make_params(output_dim, hid_dim, n_layers, seed=42):
    key = jax.random.PRNGKey(seed)
    bound = 1.0 / np.sqrt(hid_dim)
    lstm_params = []
    for l in range(n_layers):
        din = output_dim if l == 0 else hid_dim
        key, k1, k2, k3, k4 = jax.random.split(key, 5)
        w_ih = jax.random.uniform(k1, (4 * hid_dim, din), jnp.float32,
                                  -bound, bound)
        w_hh = jax.random.uniform(k2, (4 * hid_dim, hid_dim), jnp.float32,
                                  -bound, bound)
        b_ih = jax.random.uniform(k3, (4 * hid_dim,), jnp.float32,
                                  -bound, bound)
        b_hh = jax.random.uniform(k4, (4 * hid_dim,), jnp.float32,
                                  -bound, bound)
        # Store transposed weights and the folded bias for the kernel.
        lstm_params.append((w_ih.T, w_hh.T, (b_ih + b_hh).reshape(1, -1)))

    key, k5, k6 = jax.random.split(key, 3)
    fc_w = jax.random.uniform(k5, (output_dim, hid_dim), jnp.float32,
                              -bound, bound)
    fc_b = jax.random.uniform(k6, (output_dim,), jnp.float32, -bound, bound)
    return {"lstm": lstm_params,
            "fc_w_T": fc_w.T,
            "fc_b": fc_b.reshape(1, -1)}


# -----------------------------------------------------------------------------
# Main
# -----------------------------------------------------------------------------
if __name__ == "__main__":
    output_dim, hid_dim, n_layers, dropout = 4, 32, 2, 0.1
    batch, seq = 2, 8

    params = make_params(output_dim, hid_dim, n_layers, seed=42)

    key = jax.random.PRNGKey(0)
    kx, kh, kc = jax.random.split(key, 3)
    x = jax.random.normal(kx, (batch, seq, output_dim), jnp.float32)
    h_n = jax.random.normal(kh, (n_layers, batch, hid_dim), jnp.float32)
    c_n = jax.random.normal(kc, (n_layers, batch, hid_dim), jnp.float32)

    out, (h_out, c_out) = abp_decoder_forward(x, h_n, c_n, params)
    jax.block_until_ready((out, h_out, c_out))

    # Sanity check against a pure-JAX reference implementation.
    out_r, (h_r, c_r) = abp_decoder_ref(x, h_n, c_n, params)
    np.testing.assert_allclose(np.asarray(out), np.asarray(out_r),
                               rtol=1e-4, atol=1e-4)
    np.testing.assert_allclose(np.asarray(h_out), np.asarray(h_r),
                               rtol=1e-4, atol=1e-4)
    np.testing.assert_allclose(np.asarray(c_out), np.asarray(c_r),
                               rtol=1e-4, atol=1e-4)

    assert out.shape == (batch, seq, output_dim)
    assert h_out.shape == (n_layers, batch, hid_dim)
    assert c_out.shape == (n_layers, batch, hid_dim)

    print("KERNEL_OK")
</pallas_src>

<mosaic_0001>
module attributes {stable_mosaic.version = 11 : i64} {
  func.func @_decoder_kernel(%arg0: i32, %arg1: memref<16x4xf32, #tpu.memory_space<vmem>>, %arg2: memref<4x128xf32, #tpu.memory_space<vmem>>, %arg3: memref<32x128xf32, #tpu.memory_space<vmem>>, %arg4: memref<1x128xf32, #tpu.memory_space<vmem>>, %arg5: memref<32x128xf32, #tpu.memory_space<vmem>>, %arg6: memref<32x128xf32, #tpu.memory_space<vmem>>, %arg7: memref<1x128xf32, #tpu.memory_space<vmem>>, %arg8: memref<2x2x32xf32, #tpu.memory_space<vmem>>, %arg9: memref<2x2x32xf32, #tpu.memory_space<vmem>>, %arg10: memref<32x4xf32, #tpu.memory_space<vmem>>, %arg11: memref<1x4xf32, #tpu.memory_space<vmem>>, %arg12: memref<16x4xf32, #tpu.memory_space<vmem>>, %arg13: memref<2x2x32xf32, #tpu.memory_space<vmem>>, %arg14: memref<2x2x32xf32, #tpu.memory_space<vmem>>) attributes {dimension_semantics = [#tpu.dimension_semantics<arbitrary>], iteration_bounds = array<i64: 1>, scalar_prefetch = 0 : i64, scratch_operands = 0 : i64, tpu.core_type = #tpu.core_type<tc>, window_params = [{pipeline_mode = #tpu.pipeline_mode<synchronous>, transform_indices = @transform_0, window_bounds = array<i64: 16, 4>}, {pipeline_mode = #tpu.pipeline_mode<synchronous>, transform_indices = @transform_1, window_bounds = array<i64: 4, 128>}, {pipeline_mode = #tpu.pipeline_mode<synchronous>, transform_indices = @transform_2, window_bounds = array<i64: 32, 128>}, {pipeline_mode = #tpu.pipeline_mode<synchronous>, transform_indices = @transform_3, window_bounds = array<i64: 1, 128>}, {pipeline_mode = #tpu.pipeline_mode<synchronous>, transform_indices = @transform_4, window_bounds = array<i64: 32, 128>}, {pipeline_mode = #tpu.pipeline_mode<synchronous>, transform_indices = @transform_5, window_bounds = array<i64: 32, 128>}, {pipeline_mode = #tpu.pipeline_mode<synchronous>, transform_indices = @transform_6, window_bounds = array<i64: 1, 128>}, {pipeline_mode = #tpu.pipeline_mode<synchronous>, transform_indices = @transform_7, window_bounds = array<i64: 2, 2, 32>}, {pipeline_mode = #tpu.pipeline_mode<synchronous>, transform_indices = @transform_8, window_bounds = array<i64: 2, 2, 32>}, {pipeline_mode = #tpu.pipeline_mode<synchronous>, transform_indices = @transform_9, window_bounds = array<i64: 32, 4>}, {pipeline_mode = #tpu.pipeline_mode<synchronous>, transform_indices = @transform_10, window_bounds = array<i64: 1, 4>}, {pipeline_mode = #tpu.pipeline_mode<synchronous>, transform_indices = @transform_11, window_bounds = array<i64: 16, 4>}, {pipeline_mode = #tpu.pipeline_mode<synchronous>, transform_indices = @transform_12, window_bounds = array<i64: 2, 2, 32>}, {pipeline_mode = #tpu.pipeline_mode<synchronous>, transform_indices = @transform_13, window_bounds = array<i64: 2, 2, 32>}]} {
    %c0 = arith.constant 0 : index
    %c0_0 = arith.constant 0 : index
    %0 = vector.load %arg1[%c0, %c0_0] : memref<16x4xf32, #tpu.memory_space<vmem>>, vector<16x4xf32>
    %c0_1 = arith.constant 0 : index
    %c0_2 = arith.constant 0 : index
    %1 = vector.load %arg2[%c0_1, %c0_2] : memref<4x128xf32, #tpu.memory_space<vmem>>, vector<4x128xf32>
    %c0_3 = arith.constant 0 : index
    %c0_4 = arith.constant 0 : index
    %2 = vector.load %arg3[%c0_3, %c0_4] : memref<32x128xf32, #tpu.memory_space<vmem>>, vector<32x128xf32>
    %c0_5 = arith.constant 0 : index
    %c0_6 = arith.constant 0 : index
    %3 = vector.load %arg4[%c0_5, %c0_6] : memref<1x128xf32, #tpu.memory_space<vmem>>, vector<1x128xf32>
    %cst = arith.constant dense<0.000000e+00> : vector<16x128xf32>
    %4 = tpu.matmul %0, %1, %cst {dimension_numbers = #tpu.dot_dimension_numbers<[1], [0], [0], [1], [0, 0, 1, 1], [], []>} : vector<16x4xf32>, vector<4x128xf32>, vector<16x128xf32> -> vector<16x128xf32>
    %5 = vector.broadcast %3 : vector<1x128xf32> to vector<16x128xf32>
    %6 = arith.addf %4, %5 : vector<16x128xf32>
    %c0_7 = arith.constant 0 : index
    %c0_8 = arith.constant 0 : index
    %c0_9 = arith.constant 0 : index
    %7 = vector.load %arg8[%c0_7, %c0_8, %c0_9] : memref<2x2x32xf32, #tpu.memory_space<vmem>>, vector<1x2x32xf32>
    %8 = vector.shape_cast %7 : vector<1x2x32xf32> to vector<2x32xf32>
    %c0_10 = arith.constant 0 : index
    %c0_11 = arith.constant 0 : index
    %c0_12 = arith.constant 0 : index
    %9 = vector.load %arg9[%c0_10, %c0_11, %c0_12] : memref<2x2x32xf32, #tpu.memory_space<vmem>>, vector<1x2x32xf32>
    %10 = vector.shape_cast %9 : vector<1x2x32xf32> to vector<2x32xf32>
    %11 = vector.extract_strided_slice %6 {offsets = [0, 0], sizes = [2, 128], strides = [1, 1]} : vector<16x128xf32> to vector<2x128xf32>
    %cst_13 = arith.constant dense<0.000000e+00> : vector<2x128xf32>
    %12 = tpu.matmul %8, %2, %cst_13 {dimension_numbers = #tpu.dot_dimension_numbers<[1], [0], [0], [1], [0, 0, 1, 1], [], []>} : vector<2x32xf32>, vector<32x128xf32>, vector<2x128xf32> -> vector<2x128xf32>
    %13 = arith.addf %11, %12 : vector<2x128xf32>
    %14 = arith.negf %13 : vector<2x128xf32>
    %15 = math.exp %14 : vector<2x128xf32>
    %cst_14 = arith.constant 1.000000e+00 : f32
    %16 = vector.broadcast %cst_14 : f32 to vector<2x128xf32>
    %17 = arith.addf %16, %15 : vector<2x128xf32>
    %18 = arith.divf %16, %17 : vector<2x128xf32>
    %19 = math.tanh %13 : vector<2x128xf32>
    %20 = vector.extract_strided_slice %18 {offsets = [0, 0], sizes = [2, 32], strides = [1, 1]} : vector<2x128xf32> to vector<2x32xf32>
    %21 = vector.extract_strided_slice %18 {offsets = [0, 32], sizes = [2, 32], strides = [1, 1]} : vector<2x128xf32> to vector<2x32xf32>
    %22 = vector.extract_strided_slice %19 {offsets = [0, 64], sizes = [2, 32], strides = [1, 1]} : vector<2x128xf32> to vector<2x32xf32>
    %23 = vector.extract_strided_slice %18 {offsets = [0, 96], sizes = [2, 32], strides = [1, 1]} : vector<2x128xf32> to vector<2x32xf32>
    %24 = arith.mulf %21, %10 : vector<2x32xf32>
    %25 = arith.mulf %20, %22 : vector<2x32xf32>
    %26 = arith.addf %24, %25 : vector<2x32xf32>
    %27 = math.tanh %26 : vector<2x32xf32>
    %28 = arith.mulf %23, %27 : vector<2x32xf32>
    %29 = vector.extract_strided_slice %6 {offsets = [2, 0], sizes = [2, 128], strides = [1, 1]} : vector<16x128xf32> to vector<2x128xf32>
    %cst_15 = arith.constant dense<0.000000e+00> : vector<2x128xf32>
    %30 = tpu.matmul %28, %2, %cst_15 {dimension_numbers = #tpu.dot_dimension_numbers<[1], [0], [0], [1], [0, 0, 1, 1], [], []>} : vector<2x32xf32>, vector<32x128xf32>, vector<2x128xf32> -> vector<2x128xf32>
    %31 = arith.addf %29, %30 : vector<2x128xf32>
    %32 = arith.negf %31 : vector<2x128xf32>
    %33 = math.exp %32 : vector<2x128xf32>
    %cst_16 = arith.constant 1.000000e+00 : f32
    %34 = vector.broadcast %cst_16 : f32 to vector<2x128xf32>
    %35 = arith.addf %34, %33 : vector<2x128xf32>
    %36 = arith.divf %34, %35 : vector<2x128xf32>
    %37 = math.tanh %31 : vector<2x128xf32>
    %38 = vector.extract_strided_slice %36 {offsets = [0, 0], sizes = [2, 32], strides = [1, 1]} : vector<2x128xf32> to vector<2x32xf32>
    %39 = vector.extract_strided_slice %36 {offsets = [0, 32], sizes = [2, 32], strides = [1, 1]} : vector<2x128xf32> to vector<2x32xf32>
    %40 = vector.extract_strided_slice %37 {offsets = [0, 64], sizes = [2, 32], strides = [1, 1]} : vector<2x128xf32> to vector<2x32xf32>
    %41 = vector.extract_strided_slice %36 {offsets = [0, 96], sizes = [2, 32], strides = [1, 1]} : vector<2x128xf32> to vector<2x32xf32>
    %42 = arith.mulf %39, %26 : vector<2x32xf32>
    %43 = arith.mulf %38, %40 : vector<2x32xf32>
    %44 = arith.addf %42, %43 : vector<2x32xf32>
    %45 = math.tanh %44 : vector<2x32xf32>
    %46 = arith.mulf %41, %45 : vector<2x32xf32>
    %47 = vector.extract_strided_slice %6 {offsets = [4, 0], sizes = [2, 128], strides = [1, 1]} : vector<16x128xf32> to vector<2x128xf32>
    %cst_17 = arith.constant dense<0.000000e+00> : vector<2x128xf32>
    %48 = tpu.matmul %46, %2, %cst_17 {dimension_numbers = #tpu.dot_dimension_numbers<[1], [0], [0], [1], [0, 0, 1, 1], [], []>} : vector<2x32xf32>, vector<32x128xf32>, vector<2x128xf32> -> vector<2x128xf32>
    %49 = arith.addf %47, %48 : vector<2x128xf32>
    %50 = arith.negf %49 : vector<2x128xf32>
    %51 = math.exp %50 : vector<2x128xf32>
    %cst_18 = arith.constant 1.000000e+00 : f32
    %52 = vector.broadcast %cst_18 : f32 to vector<2x128xf32>
    %53 = arith.addf %52, %51 : vector<2x128xf32>
    %54 = arith.divf %52, %53 : vector<2x128xf32>
    %55 = math.tanh %49 : vector<2x128xf32>
    %56 = vector.extract_strided_slice %54 {offsets = [0, 0], sizes = [2, 32], strides = [1, 1]} : vector<2x128xf32> to vector<2x32xf32>
    %57 = vector.extract_strided_slice %54 {offsets = [0, 32], sizes = [2, 32], strides = [1, 1]} : vector<2x128xf32> to vector<2x32xf32>
    %58 = vector.extract_strided_slice %55 {offsets = [0, 64], sizes = [2, 32], strides = [1, 1]} : vector<2x128xf32> to vector<2x32xf32>
    %59 = vector.extract_strided_slice %54 {offsets = [0, 96], sizes = [2, 32], strides = [1, 1]} : vector<2x128xf32> to vector<2x32xf32>
    %60 = arith.mulf %57, %44 : vector<2x32xf32>
    %61 = arith.mulf %56, %58 : vector<2x32xf32>
    %62 = arith.addf %60, %61 : vector<2x32xf32>
    %63 = math.tanh %62 : vector<2x32xf32>
    %64 = arith.mulf %59, %63 : vector<2x32xf32>
    %65 = vector.extract_strided_slice %6 {offsets = [6, 0], sizes = [2, 128], strides = [1, 1]} : vector<16x128xf32> to vector<2x128xf32>
    %cst_19 = arith.constant dense<0.000000e+00> : vector<2x128xf32>
    %66 = tpu.matmul %64, %2, %cst_19 {dimension_numbers = #tpu.dot_dimension_numbers<[1], [0], [0], [1], [0, 0, 1, 1], [], []>} : vector<2x32xf32>, vector<32x128xf32>, vector<2x128xf32> -> vector<2x128xf32>
    %67 = arith.addf %65, %66 : vector<2x128xf32>
    %68 = arith.negf %67 : vector<2x128xf32>
    %69 = math.exp %68 : vector<2x128xf32>
    %cst_20 = arith.constant 1.000000e+00 : f32
    %70 = vector.broadcast %cst_20 : f32 to vector<2x128xf32>
    %71 = arith.addf %70, %69 : vector<2x128xf32>
    %72 = arith.divf %70, %71 : vector<2x128xf32>
    %73 = math.tanh %67 : vector<2x128xf32>
    %74 = vector.extract_strided_slice %72 {offsets = [0, 0], sizes = [2, 32], strides = [1, 1]} : vector<2x128xf32> to vector<2x32xf32>
    %75 = vector.extract_strided_slice %72 {offsets = [0, 32], sizes = [2, 32], strides = [1, 1]} : vector<2x128xf32> to vector<2x32xf32>
    %76 = vector.extract_strided_slice %73 {offsets = [0, 64], sizes = [2, 32], strides = [1, 1]} : vector<2x128xf32> to vector<2x32xf32>
    %77 = vector.extract_strided_slice %72 {offsets = [0, 96], sizes = [2, 32], strides = [1, 1]} : vector<2x128xf32> to vector<2x32xf32>
    %78 = arith.mulf %75, %62 : vector<2x32xf32>
    %79 = arith.mulf %74, %76 : vector<2x32xf32>
    %80 = arith.addf %78, %79 : vector<2x32xf32>
    %81 = math.tanh %80 : vector<2x32xf32>
    %82 = arith.mulf %77, %81 : vector<2x32xf32>
    %83 = vector.extract_strided_slice %6 {offsets = [8, 0], sizes = [2, 128], strides = [1, 1]} : vector<16x128xf32> to vector<2x128xf32>
    %cst_21 = arith.constant dense<0.000000e+00> : vector<2x128xf32>
    %84 = tpu.matmul %82, %2, %cst_21 {dimension_numbers = #tpu.dot_dimension_numbers<[1], [0], [0], [1], [0, 0, 1, 1], [], []>} : vector<2x32xf32>, vector<32x128xf32>, vector<2x128xf32> -> vector<2x128xf32>
    %85 = arith.addf %83, %84 : vector<2x128xf32>
    %86 = arith.negf %85 : vector<2x128xf32>
    %87 = math.exp %86 : vector<2x128xf32>
    %cst_22 = arith.constant 1.000000e+00 : f32
    %88 = vector.broadcast %cst_22 : f32 to vector<2x128xf32>
    %89 = arith.addf %88, %87 : vector<2x128xf32>
    %90 = arith.divf %88, %89 : vector<2x128xf32>
    %91 = math.tanh %85 : vector<2x128xf32>
    %92 = vector.extract_strided_slice %90 {offsets = [0, 0], sizes = [2, 32], strides = [1, 1]} : vector<2x128xf32> to vector<2x32xf32>
    %93 = vector.extract_strided_slice %90 {offsets = [0, 32], sizes = [2, 32], strides = [1, 1]} : vector<2x128xf32> to vector<2x32xf32>
    %94 = vector.extract_strided_slice %91 {offsets = [0, 64], sizes = [2, 32], strides = [1, 1]} : vector<2x128xf32> to vector<2x32xf32>
    %95 = vector.extract_strided_slice %90 {offsets = [0, 96], sizes = [2, 32], strides = [1, 1]} : vector<2x128xf32> to vector<2x32xf32>
    %96 = arith.mulf %93, %80 : vector<2x32xf32>
    %97 = arith.mulf %92, %94 : vector<2x32xf32>
    %98 = arith.addf %96, %97 : vector<2x32xf32>
    %99 = math.tanh %98 : vector<2x32xf32>
    %100 = arith.mulf %95, %99 : vector<2x32xf32>
    %101 = vector.extract_strided_slice %6 {offsets = [10, 0], sizes = [2, 128], strides = [1, 1]} : vector<16x128xf32> to vector<2x128xf32>
    %cst_23 = arith.constant dense<0.000000e+00> : vector<2x128xf32>
    %102 = tpu.matmul %100, %2, %cst_23 {dimension_numbers = #tpu.dot_dimension_numbers<[1], [0], [0], [1], [0, 0, 1, 1], [], []>} : vector<2x32xf32>, vector<32x128xf32>, vector<2x128xf32> -> vector<2x128xf32>
    %103 = arith.addf %101, %102 : vector<2x128xf32>
    %104 = arith.negf %103 : vector<2x128xf32>
    %105 = math.exp %104 : vector<2x128xf32>
    %cst_24 = arith.constant 1.000000e+00 : f32
    %106 = vector.broadcast %cst_24 : f32 to vector<2x128xf32>
    %107 = arith.addf %106, %105 : vector<2x128xf32>
    %108 = arith.divf %106, %107 : vector<2x128xf32>
    %109 = math.tanh %103 : vector<2x128xf32>
    %110 = vector.extract_strided_slice %108 {offsets = [0, 0], sizes = [2, 32], strides = [1, 1]} : vector<2x128xf32> to vector<2x32xf32>
    %111 = vector.extract_strided_slice %108 {offsets = [0, 32], sizes = [2, 32], strides = [1, 1]} : vector<2x128xf32> to vector<2x32xf32>
    %112 = vector.extract_strided_slice %109 {offsets = [0, 64], sizes = [2, 32], strides = [1, 1]} : vector<2x128xf32> to vector<2x32xf32>
    %113 = vector.extract_strided_slice %108 {offsets = [0, 96], sizes = [2, 32], strides = [1, 1]} : vector<2x128xf32> to vector<2x32xf32>
    %114 = arith.mulf %111, %98 : vector<2x32xf32>
    %115 = arith.mulf %110, %112 : vector<2x32xf32>
    %116 = arith.addf %114, %115 : vector<2x32xf32>
    %117 = math.tanh %116 : vector<2x32xf32>
    %118 = arith.mulf %113, %117 : vector<2x32xf32>
    %119 = vector.extract_strided_slice %6 {offsets = [12, 0], sizes = [2, 128], strides = [1, 1]} : vector<16x128xf32> to vector<2x128xf32>
    %cst_25 = arith.constant dense<0.000000e+00> : vector<2x128xf32>
    %120 = tpu.matmul %118, %2, %cst_25 {dimension_numbers = #tpu.dot_dimension_numbers<[1], [0], [0], [1], [0, 0, 1, 1], [], []>} : vector<2x32xf32>, vector<32x128xf32>, vector<2x128xf32> -> vector<2x128xf32>
    %121 = arith.addf %119, %120 : vector<2x128xf32>
    %122 = arith.negf %121 : vector<2x128xf32>
    %123 = math.exp %122 : vector<2x128xf32>
    %cst_26 = arith.constant 1.000000e+00 : f32
    %124 = vector.broadcast %cst_26 : f32 to vector<2x128xf32>
    %125 = arith.addf %124, %123 : vector<2x128xf32>
    %126 = arith.divf %124, %125 : vector<2x128xf32>
    %127 = math.tanh %121 : vector<2x128xf32>
    %128 = vector.extract_strided_slice %126 {offsets = [0, 0], sizes = [2, 32], strides = [1, 1]} : vector<2x128xf32> to vector<2x32xf32>
    %129 = vector.extract_strided_slice %126 {offsets = [0, 32], sizes = [2, 32], strides = [1, 1]} : vector<2x128xf32> to vector<2x32xf32>
    %130 = vector.extract_strided_slice %127 {offsets = [0, 64], sizes = [2, 32], strides = [1, 1]} : vector<2x128xf32> to vector<2x32xf32>
    %131 = vector.extract_strided_slice %126 {offsets = [0, 96], sizes = [2, 32], strides = [1, 1]} : vector<2x128xf32> to vector<2x32xf32>
    %132 = arith.mulf %129, %116 : vector<2x32xf32>
    %133 = arith.mulf %128, %130 : vector<2x32xf32>
    %134 = arith.addf %132, %133 : vector<2x32xf32>
    %135 = math.tanh %134 : vector<2x32xf32>
    %136 = arith.mulf %131, %135 : vector<2x32xf32>
    %137 = vector.extract_strided_slice %6 {offsets = [14, 0], sizes = [2, 128], strides = [1, 1]} : vector<16x128xf32> to vector<2x128xf32>
    %cst_27 = arith.constant dense<0.000000e+00> : vector<2x128xf32>
    %138 = tpu.matmul %136, %2, %cst_27 {dimension_numbers = #tpu.dot_dimension_numbers<[1], [0], [0], [1], [0, 0, 1, 1], [], []>} : vector<2x32xf32>, vector<32x128xf32>, vector<2x128xf32> -> vector<2x128xf32>
    %139 = arith.addf %137, %138 : vector<2x128xf32>
    %140 = arith.negf %139 : vector<2x128xf32>
    %141 = math.exp %140 : vector<2x128xf32>
    %cst_28 = arith.constant 1.000000e+00 : f32
    %142 = vector.broadcast %cst_28 : f32 to vector<2x128xf32>
    %143 = arith.addf %142, %141 : vector<2x128xf32>
    %144 = arith.divf %142, %143 : vector<2x128xf32>
    %145 = math.tanh %139 : vector<2x128xf32>
    %146 = vector.extract_strided_slice %144 {offsets = [0, 0], sizes = [2, 32], strides = [1, 1]} : vector<2x128xf32> to vector<2x32xf32>
    %147 = vector.extract_strided_slice %144 {offsets = [0, 32], sizes = [2, 32], strides = [1, 1]} : vector<2x128xf32> to vector<2x32xf32>
    %148 = vector.extract_strided_slice %145 {offsets = [0, 64], sizes = [2, 32], strides = [1, 1]} : vector<2x128xf32> to vector<2x32xf32>
    %149 = vector.extract_strided_slice %144 {offsets = [0, 96], sizes = [2, 32], strides = [1, 1]} : vector<2x128xf32> to vector<2x32xf32>
    %150 = arith.mulf %147, %134 : vector<2x32xf32>
    %151 = arith.mulf %146, %148 : vector<2x32xf32>
    %152 = arith.addf %150, %151 : vector<2x32xf32>
    %153 = math.tanh %152 : vector<2x32xf32>
    %154 = arith.mulf %149, %153 : vector<2x32xf32>
    %c0_29 = arith.constant 0 : index
    %c0_30 = arith.constant 0 : index
    %c0_31 = arith.constant 0 : index
    %155 = vector.load %arg13[%c0_29, %c0_30, %c0_31] : memref<2x2x32xf32, #tpu.memory_space<vmem>>, vector<1x2x32xf32>
    %156 = vector.shape_cast %155 : vector<1x2x32xf32> to vector<2x32xf32>
    %157 = vector.shape_cast %154 : vector<2x32xf32> to vector<1x2x32xf32>
    tpu.vector_store %arg13[%c0_29, %c0_30, %c0_31], %157 {strides = array<i32>} : memref<2x2x32xf32, #tpu.memory_space<vmem>>, vector<1x2x32xf32>,
    %c0_32 = arith.constant 0 : index
    %c0_33 = arith.constant 0 : index
    %c0_34 = arith.constant 0 : index
    %158 = vector.load %arg14[%c0_32, %c0_33, %c0_34] : memref<2x2x32xf32, #tpu.memory_space<vmem>>, vector<1x2x32xf32>
    %159 = vector.shape_cast %158 : vector<1x2x32xf32> to vector<2x32xf32>
    %160 = vector.shape_cast %152 : vector<2x32xf32> to vector<1x2x32xf32>
    tpu.vector_store %arg14[%c0_32, %c0_33, %c0_34], %160 {strides = array<i32>} : memref<2x2x32xf32, #tpu.memory_space<vmem>>, vector<1x2x32xf32>,
    %161 = tpu.concatenate %28, %46, %64, %82, %100, %118, %136, %154 in 0 : vector<2x32xf32>, vector<2x32xf32>, vector<2x32xf32>, vector<2x32xf32>, vector<2x32xf32>, vector<2x32xf32>, vector<2x32xf32>, vector<2x32xf32> -> vector<16x32xf32>
    %c0_35 = arith.constant 0 : index
    %c0_36 = arith.constant 0 : index
    %162 = vector.load %arg5[%c0_35, %c0_36] : memref<32x128xf32, #tpu.memory_space<vmem>>, vector<32x128xf32>
    %c0_37 = arith.constant 0 : index
    %c0_38 = arith.constant 0 : index
    %163 = vector.load %arg6[%c0_37, %c0_38] : memref<32x128xf32, #tpu.memory_space<vmem>>, vector<32x128xf32>
    %c0_39 = arith.constant 0 : index
    %c0_40 = arith.constant 0 : index
    %164 = vector.load %arg7[%c0_39, %c0_40] : memref<1x128xf32, #tpu.memory_space<vmem>>, vector<1x128xf32>
    %cst_41 = arith.constant dense<0.000000e+00> : vector<16x128xf32>
    %165 = tpu.matmul %161, %162, %cst_41 {dimension_numbers = #tpu.dot_dimension_numbers<[1], [0], [0], [1], [0, 0, 1, 1], [], []>} : vector<16x32xf32>, vector<32x128xf32>, vector<16x128xf32> -> vector<16x128xf32>
    %166 = vector.broadcast %164 : vector<1x128xf32> to vector<16x128xf32>
    %167 = arith.addf %165, %166 : vector<16x128xf32>
    %c1 = arith.constant 1 : index
    %c0_42 = arith.constant 0 : index
    %c0_43 = arith.constant 0 : index
    %168 = vector.load %arg8[%c1, %c0_42, %c0_43] : memref<2x2x32xf32, #tpu.memory_space<vmem>>, vector<1x2x32xf32>
    %169 = vector.shape_cast %168 : vector<1x2x32xf32> to vector<2x32xf32>
    %c1_44 = arith.constant 1 : index
    %c0_45 = arith.constant 0 : index
    %c0_46 = arith.constant 0 : index
    %170 = vector.load %arg9[%c1_44, %c0_45, %c0_46] : memref<2x2x32xf32, #tpu.memory_space<vmem>>, vector<1x2x32xf32>
    %171 = vector.shape_cast %170 : vector<1x2x32xf32> to vector<2x32xf32>
    %172 = vector.extract_strided_slice %167 {offsets = [0, 0], sizes = [2, 128], strides = [1, 1]} : vector<16x128xf32> to vector<2x128xf32>
    %cst_47 = arith.constant dense<0.000000e+00> : vector<2x128xf32>
    %173 = tpu.matmul %169, %163, %cst_47 {dimension_numbers = #tpu.dot_dimension_numbers<[1], [0], [0], [1], [0, 0, 1, 1], [], []>} : vector<2x32xf32>, vector<32x128xf32>, vector<2x128xf32> -> vector<2x128xf32>
    %174 = arith.addf %172, %173 : vector<2x128xf32>
    %175 = arith.negf %174 : vector<2x128xf32>
    %176 = math.exp %175 : vector<2x128xf32>
    %cst_48 = arith.constant 1.000000e+00 : f32
    %177 = vector.broadcast %cst_48 : f32 to vector<2x128xf32>
    %178 = arith.addf %177, %176 : vector<2x128xf32>
    %179 = arith.divf %177, %178 : vector<2x128xf32>
    %180 = math.tanh %174 : vector<2x128xf32>
    %181 = vector.extract_strided_slice %179 {offsets = [0, 0], sizes = [2, 32], strides = [1, 1]} : vector<2x128xf32> to vector<2x32xf32>
    %182 = vector.extract_strided_slice %179 {offsets = [0, 32], sizes = [2, 32], strides = [1, 1]} : vector<2x128xf32> to vector<2x32xf32>
    %183 = vector.extract_strided_slice %180 {offsets = [0, 64], sizes = [2, 32], strides = [1, 1]} : vector<2x128xf32> to vector<2x32xf32>
    %184 = vector.extract_strided_slice %179 {offsets = [0, 96], sizes = [2, 32], strides = [1, 1]} : vector<2x128xf32> to vector<2x32xf32>
    %185 = arith.mulf %182, %171 : vector<2x32xf32>
    %186 = arith.mulf %181, %183 : vector<2x32xf32>
    %187 = arith.addf %185, %186 : vector<2x32xf32>
    %188 = math.tanh %187 : vector<2x32xf32>
    %189 = arith.mulf %184, %188 : vector<2x32xf32>
    %190 = vector.extract_strided_slice %167 {offsets = [2, 0], sizes = [2, 128], strides = [1, 1]} : vector<16x128xf32> to vector<2x128xf32>
    %cst_49 = arith.constant dense<0.000000e+00> : vector<2x128xf32>
    %191 = tpu.matmul %189, %163, %cst_49 {dimension_numbers = #tpu.dot_dimension_numbers<[1], [0], [0], [1], [0, 0, 1, 1], [], []>} : vector<2x32xf32>, vector<32x128xf32>, vector<2x128xf32> -> vector<2x128xf32>
    %192 = arith.addf %190, %191 : vector<2x128xf32>
    %193 = arith.negf %192 : vector<2x128xf32>
    %194 = math.exp %193 : vector<2x128xf32>
    %cst_50 = arith.constant 1.000000e+00 : f32
    %195 = vector.broadcast %cst_50 : f32 to vector<2x128xf32>
    %196 = arith.addf %195, %194 : vector<2x128xf32>
    %197 = arith.divf %195, %196 : vector<2x128xf32>
    %198 = math.tanh %192 : vector<2x128xf32>
    %199 = vector.extract_strided_slice %197 {offsets = [0, 0], sizes = [2, 32], strides = [1, 1]} : vector<2x128xf32> to vector<2x32xf32>
    %200 = vector.extract_strided_slice %197 {offsets = [0, 32], sizes = [2, 32], strides = [1, 1]} : vector<2x128xf32> to vector<2x32xf32>
    %201 = vector.extract_strided_slice %198 {offsets = [0, 64], sizes = [2, 32], strides = [1, 1]} : vector<2x128xf32> to vector<2x32xf32>
    %202 = vector.extract_strided_slice %197 {offsets = [0, 96], sizes = [2, 32], strides = [1, 1]} : vector<2x128xf32> to vector<2x32xf32>
    %203 = arith.mulf %200, %187 : vector<2x32xf32>
    %204 = arith.mulf %199, %201 : vector<2x32xf32>
    %205 = arith.addf %203, %204 : vector<2x32xf32>
    %206 = math.tanh %205 : vector<2x32xf32>
    %207 = arith.mulf %202, %206 : vector<2x32xf32>
    %208 = vector.extract_strided_slice %167 {offsets = [4, 0], sizes = [2, 128], strides = [1, 1]} : vector<16x128xf32> to vector<2x128xf32>
    %cst_51 = arith.constant dense<0.000000e+00> : vector<2x128xf32>
    %209 = tpu.matmul %207, %163, %cst_51 {dimension_numbers = #tpu.dot_dimension_numbers<[1], [0], [0], [1], [0, 0, 1, 1], [], []>} : vector<2x32xf32>, vector<32x128xf32>, vector<2x128xf32> -> vector<2x128xf32>
    %210 = arith.addf %208, %209 : vector<2x128xf32>
    %211 = arith.negf %210 : vector<2x128xf32>
    %212 = math.exp %211 : vector<2x128xf32>
    %cst_52 = arith.constant 1.000000e+00 : f32
    %213 = vector.broadcast %cst_52 : f32 to vector<2x128xf32>
    %214 = arith.addf %213, %212 : vector<2x128xf32>
    %215 = arith.divf %213, %214 : vector<2x128xf32>
    %216 = math.tanh %210 : vector<2x128xf32>
    %217 = vector.extract_strided_slice %215 {offsets = [0, 0], sizes = [2, 32], strides = [1, 1]} : vector<2x128xf32> to vector<2x32xf32>
    %218 = vector.extract_strided_slice %215 {offsets = [0, 32], sizes = [2, 32], strides = [1, 1]} : vector<2x128xf32> to vector<2x32xf32>
    %219 = vector.extract_strided_slice %216 {offsets = [0, 64], sizes = [2, 32], strides = [1, 1]} : vector<2x128xf32> to vector<2x32xf32>
    %220 = vector.extract_strided_slice %215 {offsets = [0, 96], sizes = [2, 32], strides = [1, 1]} : vector<2x128xf32> to vector<2x32xf32>
    %221 = arith.mulf %218, %205 : vector<2x32xf32>
    %222 = arith.mulf %217, %219 : vector<2x32xf32>
    %223 = arith.addf %221, %222 : vector<2x32xf32>
    %224 = math.tanh %223 : vector<2x32xf32>
    %225 = arith.mulf %220, %224 : vector<2x32xf32>
    %226 = vector.extract_strided_slice %167 {offsets = [6, 0], sizes = [2, 128], strides = [1, 1]} : vector<16x128xf32> to vector<2x128xf32>
    %cst_53 = arith.constant dense<0.000000e+00> : vector<2x128xf32>
    %227 = tpu.matmul %225, %163, %cst_53 {dimension_numbers = #tpu.dot_dimension_numbers<[1], [0], [0], [1], [0, 0, 1, 1], [], []>} : vector<2x32xf32>, vector<32x128xf32>, vector<2x128xf32> -> vector<2x128xf32>
    %228 = arith.addf %226, %227 : vector<2x128xf32>
    %229 = arith.negf %228 : vector<2x128xf32>
    %230 = math.exp %229 : vector<2x128xf32>
    %cst_54 = arith.constant 1.000000e+00 : f32
    %231 = vector.broadcast %cst_54 : f32 to vector<2x128xf32>
    %232 = arith.addf %231, %230 : vector<2x128xf32>
    %233 = arith.divf %231, %232 : vector<2x128xf32>
    %234 = math.tanh %228 : vector<2x128xf32>
    %235 = vector.extract_strided_slice %233 {offsets = [0, 0], sizes = [2, 32], strides = [1, 1]} : vector<2x128xf32> to vector<2x32xf32>
    %236 = vector.extract_strided_slice %233 {offsets = [0, 32], sizes = [2, 32], strides = [1, 1]} : vector<2x128xf32> to vector<2x32xf32>
    %237 = vector.extract_strided_slice %234 {offsets = [0, 64], sizes = [2, 32], strides = [1, 1]} : vector<2x128xf32> to vector<2x32xf32>
    %238 = vector.extract_strided_slice %233 {offsets = [0, 96], sizes = [2, 32], strides = [1, 1]} : vector<2x128xf32> to vector<2x32xf32>
    %239 = arith.mulf %236, %223 : vector<2x32xf32>
    %240 = arith.mulf %235, %237 : vector<2x32xf32>
    %241 = arith.addf %239, %240 : vector<2x32xf32>
    %242 = math.tanh %241 : vector<2x32xf32>
    %243 = arith.mulf %238, %242 : vector<2x32xf32>
    %244 = vector.extract_strided_slice %167 {offsets = [8, 0], sizes = [2, 128], strides = [1, 1]} : vector<16x128xf32> to vector<2x128xf32>
    %cst_55 = arith.constant dense<0.000000e+00> : vector<2x128xf32>
    %245 = tpu.matmul %243, %163, %cst_55 {dimension_numbers = #tpu.dot_dimension_numbers<[1], [0], [0], [1], [0, 0, 1, 1], [], []>} : vector<2x32xf32>, vector<32x128xf32>, vector<2x128xf32> -> vector<2x128xf32>
    %246 = arith.addf %244, %245 : vector<2x128xf32>
    %247 = arith.negf %246 : vector<2x128xf32>
    %248 = math.exp %247 : vector<2x128xf32>
    %cst_56 = arith.constant 1.000000e+00 : f32
    %249 = vector.broadcast %cst_56 : f32 to vector<2x128xf32>
    %250 = arith.addf %249, %248 : vector<2x128xf32>
    %251 = arith.divf %249, %250 : vector<2x128xf32>
    %252 = math.tanh %246 : vector<2x128xf32>
    %253 = vector.extract_strided_slice %251 {offsets = [0, 0], sizes = [2, 32], strides = [1, 1]} : vector<2x128xf32> to vector<2x32xf32>
    %254 = vector.extract_strided_slice %251 {offsets = [0, 32], sizes = [2, 32], strides = [1, 1]} : vector<2x128xf32> to vector<2x32xf32>
    %255 = vector.extract_strided_slice %252 {offsets = [0, 64], sizes = [2, 32], strides = [1, 1]} : vector<2x128xf32> to vector<2x32xf32>
    %256 = vector.extract_strided_slice %251 {offsets = [0, 96], sizes = [2, 32], strides = [1, 1]} : vector<2x128xf32> to vector<2x32xf32>
    %257 = arith.mulf %254, %241 : vector<2x32xf32>
    %258 = arith.mulf %253, %255 : vector<2x32xf32>
    %259 = arith.addf %257, %258 : vector<2x32xf32>
    %260 = math.tanh %259 : vector<2x32xf32>
    %261 = arith.mulf %256, %260 : vector<2x32xf32>
    %262 = vector.extract_strided_slice %167 {offsets = [10, 0], sizes = [2, 128], strides = [1, 1]} : vector<16x128xf32> to vector<2x128xf32>
    %cst_57 = arith.constant dense<0.000000e+00> : vector<2x128xf32>
    %263 = tpu.matmul %261, %163, %cst_57 {dimension_numbers = #tpu.dot_dimension_numbers<[1], [0], [0], [1], [0, 0, 1, 1], [], []>} : vector<2x32xf32>, vector<32x128xf32>, vector<2x128xf32> -> vector<2x128xf32>
    %264 = arith.addf %262, %263 : vector<2x128xf32>
    %265 = arith.negf %264 : vector<2x128xf32>
    %266 = math.exp %265 : vector<2x128xf32>
    %cst_58 = arith.constant 1.000000e+00 : f32
    %267 = vector.broadcast %cst_58 : f32 to vector<2x128xf32>
    %268 = arith.addf %267, %266 : vector<2x128xf32>
    %269 = arith.divf %267, %268 : vector<2x128xf32>
    %270 = math.tanh %264 : vector<2x128xf32>
    %271 = vector.extract_strided_slice %269 {offsets = [0, 0], sizes = [2, 32], strides = [1, 1]} : vector<2x128xf32> to vector<2x32xf32>
    %272 = vector.extract_strided_slice %269 {offsets = [0, 32], sizes = [2, 32], strides = [1, 1]} : vector<2x128xf32> to vector<2x32xf32>
    %273 = vector.extract_strided_slice %270 {offsets = [0, 64], sizes = [2, 32], strides = [1, 1]} : vector<2x128xf32> to vector<2x32xf32>
    %274 = vector.extract_strided_slice %269 {offsets = [0, 96], sizes = [2, 32], strides = [1, 1]} : vector<2x128xf32> to vector<2x32xf32>
    %275 = arith.mulf %272, %259 : vector<2x32xf32>
    %276 = arith.mulf %271, %273 : vector<2x32xf32>
    %277 = arith.addf %275, %276 : vector<2x32xf32>
    %278 = math.tanh %277 : vector<2x32xf32>
    %279 = arith.mulf %274, %278 : vector<2x32xf32>
    %280 = vector.extract_strided_slice %167 {offsets = [12, 0], sizes = [2, 128], strides = [1, 1]} : vector<16x128xf32> to vector<2x128xf32>
    %cst_59 = arith.constant dense<0.000000e+00> : vector<2x128xf32>
    %281 = tpu.matmul %279, %163, %cst_59 {dimension_numbers = #tpu.dot_dimension_numbers<[1], [0], [0], [1], [0, 0, 1, 1], [], []>} : vector<2x32xf32>, vector<32x128xf32>, vector<2x128xf32> -> vector<2x128xf32>
    %282 = arith.addf %280, %281 : vector<2x128xf32>
    %283 = arith.negf %282 : vector<2x128xf32>
    %284 = math.exp %283 : vector<2x128xf32>
    %cst_60 = arith.constant 1.000000e+00 : f32
    %285 = vector.broadcast %cst_60 : f32 to vector<2x128xf32>
    %286 = arith.addf %285, %284 : vector<2x128xf32>
    %287 = arith.divf %285, %286 : vector<2x128xf32>
    %288 = math.tanh %282 : vector<2x128xf32>
    %289 = vector.extract_strided_slice %287 {offsets = [0, 0], sizes = [2, 32], strides = [1, 1]} : vector<2x128xf32> to vector<2x32xf32>
    %290 = vector.extract_strided_slice %287 {offsets = [0, 32], sizes = [2, 32], strides = [1, 1]} : vector<2x128xf32> to vector<2x32xf32>
    %291 = vector.extract_strided_slice %288 {offsets = [0, 64], sizes = [2, 32], strides = [1, 1]} : vector<2x128xf32> to vector<2x32xf32>
    %292 = vector.extract_strided_slice %287 {offsets = [0, 96], sizes = [2, 32], strides = [1, 1]} : vector<2x128xf32> to vector<2x32xf32>
    %293 = arith.mulf %290, %277 : vector<2x32xf32>
    %294 = arith.mulf %289, %291 : vector<2x32xf32>
    %295 = arith.addf %293, %294 : vector<2x32xf32>
    %296 = math.tanh %295 : vector<2x32xf32>
    %297 = arith.mulf %292, %296 : vector<2x32xf32>
    %298 = vector.extract_strided_slice %167 {offsets = [14, 0], sizes = [2, 128], strides = [1, 1]} : vector<16x128xf32> to vector<2x128xf32>
    %cst_61 = arith.constant dense<0.000000e+00> : vector<2x128xf32>
    %299 = tpu.matmul %297, %163, %cst_61 {dimension_numbers = #tpu.dot_dimension_numbers<[1], [0], [0], [1], [0, 0, 1, 1], [], []>} : vector<2x32xf32>, vector<32x128xf32>, vector<2x128xf32> -> vector<2x128xf32>
    %300 = arith.addf %298, %299 : vector<2x128xf32>
    %301 = arith.negf %300 : vector<2x128xf32>
    %302 = math.exp %301 : vector<2x128xf32>
    %cst_62 = arith.constant 1.000000e+00 : f32
    %303 = vector.broadcast %cst_62 : f32 to vector<2x128xf32>
    %304 = arith.addf %303, %302 : vector<2x128xf32>
    %305 = arith.divf %303, %304 : vector<2x128xf32>
    %306 = math.tanh %300 : vector<2x128xf32>
    %307 = vector.extract_strided_slice %305 {offsets = [0, 0], sizes = [2, 32], strides = [1, 1]} : vector<2x128xf32> to vector<2x32xf32>
    %308 = vector.extract_strided_slice %305 {offsets = [0, 32], sizes = [2, 32], strides = [1, 1]} : vector<2x128xf32> to vector<2x32xf32>
    %309 = vector.extract_strided_slice %306 {offsets = [0, 64], sizes = [2, 32], strides = [1, 1]} : vector<2x128xf32> to vector<2x32xf32>
    %310 = vector.extract_strided_slice %305 {offsets = [0, 96], sizes = [2, 32], strides = [1, 1]} : vector<2x128xf32> to vector<2x32xf32>
    %311 = arith.mulf %308, %295 : vector<2x32xf32>
    %312 = arith.mulf %307, %309 : vector<2x32xf32>
    %313 = arith.addf %311, %312 : vector<2x32xf32>
    %314 = math.tanh %313 : vector<2x32xf32>
    %315 = arith.mulf %310, %314 : vector<2x32xf32>
    %c1_63 = arith.constant 1 : index
    %c0_64 = arith.constant 0 : index
    %c0_65 = arith.constant 0 : index
    %316 = vector.load %arg13[%c1_63, %c0_64, %c0_65] : memref<2x2x32xf32, #tpu.memory_space<vmem>>, vector<1x2x32xf32>
    %317 = vector.shape_cast %316 : vector<1x2x32xf32> to vector<2x32xf32>
    %318 = vector.shape_cast %315 : vector<2x32xf32> to vector<1x2x32xf32>
    tpu.vector_store %arg13[%c1_63, %c0_64, %c0_65], %318 {strides = array<i32>} : memref<2x2x32xf32, #tpu.memory_space<vmem>>, vector<1x2x32xf32>,
    %c1_66 = arith.constant 1 : index
    %c0_67 = arith.constant 0 : index
    %c0_68 = arith.constant 0 : index
    %319 = vector.load %arg14[%c1_66, %c0_67, %c0_68] : memref<2x2x32xf32, #tpu.memory_space<vmem>>, vector<1x2x32xf32>
    %320 = vector.shape_cast %319 : vector<1x2x32xf32> to vector<2x32xf32>
    %321 = vector.shape_cast %313 : vector<2x32xf32> to vector<1x2x32xf32>
    tpu.vector_store %arg14[%c1_66, %c0_67, %c0_68], %321 {strides = array<i32>} : memref<2x2x32xf32, #tpu.memory_space<vmem>>, vector<1x2x32xf32>,
    %322 = tpu.concatenate %189, %207, %225, %243, %261, %279, %297, %315 in 0 : vector<2x32xf32>, vector<2x32xf32>, vector<2x32xf32>, vector<2x32xf32>, vector<2x32xf32>, vector<2x32xf32>, vector<2x32xf32>, vector<2x32xf32> -> vector<16x32xf32>
    %c0_69 = arith.constant 0 : index
    %c0_70 = arith.constant 0 : index
    %323 = vector.load %arg10[%c0_69, %c0_70] : memref<32x4xf32, #tpu.memory_space<vmem>>, vector<32x4xf32>
    %cst_71 = arith.constant dense<0.000000e+00> : vector<16x4xf32>
    %324 = tpu.matmul %322, %323, %cst_71 {dimension_numbers = #tpu.dot_dimension_numbers<[1], [0], [0], [1], [0, 0, 1, 1], [], []>} : vector<16x32xf32>, vector<32x4xf32>, vector<16x4xf32> -> vector<16x4xf32>
    %c0_72 = arith.constant 0 : index
    %c0_73 = arith.constant 0 : index
    %325 = vector.load %arg11[%c0_72, %c0_73] : memref<1x4xf32, #tpu.memory_space<vmem>>, vector<1x4xf32>
    %326 = vector.broadcast %325 : vector<1x4xf32> to vector<16x4xf32>
    %327 = arith.addf %324, %326 : vector<16x4xf32>
    %c0_74 = arith.constant 0 : index
    %c0_75 = arith.constant 0 : index
    %328 = vector.load %arg12[%c0_74, %c0_75] : memref<16x4xf32, #tpu.memory_space<vmem>>, vector<16x4xf32>
    tpu.vector_store %arg12[%c0_74, %c0_75], %327 {strides = array<i32>} : memref<16x4xf32, #tpu.memory_space<vmem>>, vector<16x4xf32>,
    return
  }
  func.func @transform_0(%arg0: i32) -> (i32, i32) {
    %c0_i32 = arith.constant 0 : i32
    %c0_i32_0 = arith.constant 0 : i32
    %c0_i32_1 = arith.constant 0 : i32
    return %c0_i32, %c0_i32_0 : i32, i32
  }
  func.func @transform_1(%arg0: i32) -> (i32, i32) {
    %c0_i32 = arith.constant 0 : i32
    %c0_i32_0 = arith.constant 0 : i32
    %c0_i32_1 = arith.constant 0 : i32
    return %c0_i32, %c0_i32_0 : i32, i32
  }
  func.func @transform_2(%arg0: i32) -> (i32, i32) {
    %c0_i32 = arith.constant 0 : i32
    %c0_i32_0 = arith.constant 0 : i32
    %c0_i32_1 = arith.constant 0 : i32
    return %c0_i32, %c0_i32_0 : i32, i32
  }
  func.func @transform_3(%arg0: i32) -> (i32, i32) {
    %c0_i32 = arith.constant 0 : i32
    %c0_i32_0 = arith.constant 0 : i32
    %c0_i32_1 = arith.constant 0 : i32
    return %c0_i32, %c0_i32_0 : i32, i32
  }
  func.func @transform_4(%arg0: i32) -> (i32, i32) {
    %c0_i32 = arith.constant 0 : i32
    %c0_i32_0 = arith.constant 0 : i32
    %c0_i32_1 = arith.constant 0 : i32
    return %c0_i32, %c0_i32_0 : i32, i32
  }
  func.func @transform_5(%arg0: i32) -> (i32, i32) {
    %c0_i32 = arith.constant 0 : i32
    %c0_i32_0 = arith.constant 0 : i32
    %c0_i32_1 = arith.constant 0 : i32
    return %c0_i32, %c0_i32_0 : i32, i32
  }
  func.func @transform_6(%arg0: i32) -> (i32, i32) {
    %c0_i32 = arith.constant 0 : i32
    %c0_i32_0 = arith.constant 0 : i32
    %c0_i32_1 = arith.constant 0 : i32
    return %c0_i32, %c0_i32_0 : i32, i32
  }
  func.func @transform_7(%arg0: i32) -> (i32, i32, i32) {
    %c0_i32 = arith.constant 0 : i32
    %c0_i32_0 = arith.constant 0 : i32
    %c0_i32_1 = arith.constant 0 : i32
    %c0_i32_2 = arith.constant 0 : i32
    return %c0_i32, %c0_i32_0, %c0_i32_1 : i32, i32, i32
  }
  func.func @transform_8(%arg0: i32) -> (i32, i32, i32) {
    %c0_i32 = arith.constant 0 : i32
    %c0_i32_0 = arith.constant 0 : i32
    %c0_i32_1 = arith.constant 0 : i32
    %c0_i32_2 = arith.constant 0 : i32
    return %c0_i32, %c0_i32_0, %c0_i32_1 : i32, i32, i32
  }
  func.func @transform_9(%arg0: i32) -> (i32, i32) {
    %c0_i32 = arith.constant 0 : i32
    %c0_i32_0 = arith.constant 0 : i32
    %c0_i32_1 = arith.constant 0 : i32
    return %c0_i32, %c0_i32_0 : i32, i32
  }
  func.func @transform_10(%arg0: i32) -> (i32, i32) {
    %c0_i32 = arith.constant 0 : i32
    %c0_i32_0 = arith.constant 0 : i32
    %c0_i32_1 = arith.constant 0 : i32
    return %c0_i32, %c0_i32_0 : i32, i32
  }
  func.func @transform_11(%arg0: i32) -> (i32, i32) {
    %c0_i32 = arith.constant 0 : i32
    %c0_i32_0 = arith.constant 0 : i32
    %c0_i32_1 = arith.constant 0 : i32
    return %c0_i32, %c0_i32_0 : i32, i32
  }
  func.func @transform_12(%arg0: i32) -> (i32, i32, i32) {
    %c0_i32 = arith.constant 0 : i32
    %c0_i32_0 = arith.constant 0 : i32
    %c0_i32_1 = arith.constant 0 : i32
    %c0_i32_2 = arith.constant 0 : i32
    return %c0_i32, %c0_i32_0, %c0_i32_1 : i32, i32, i32
  }
  func.func @transform_13(%arg0: i32) -> (i32, i32, i32) {
    %c0_i32 = arith.constant 0 : i32
    %c0_i32_0 = arith.constant 0 : i32
    %c0_i32_1 = arith.constant 0 : i32
    %c0_i32_2 = arith.constant 0 : i32
    return %c0_i32, %c0_i32_0, %c0_i32_1 : i32, i32, i32
  }
}

</mosaic_0001>

<bundles_post_ra>
// kernel: abp_decoder_forward.1
= control target key start
LH: loop header
LB: loop body
LE: loop exit
PB: predicated region body
PF: predicated region fallthrough
CT: control target
= control target key end

     0   :  { %19 = vsyncpa [#allocation3], 0  ;;  %s3297_s0 = inlined_call_operand.vmem [shape: f32[16,4], index: 0, kind: input, shape index: {}]   ;;  %s3298_s1 = inlined_call_operand.vmem [shape: f32[4,128], index: 1, kind: input, shape index: {}]   ;;  %s3299_s2 = inlined_call_operand.vmem [shape: f32[32,128], index: 2, kind: input, shape index: {}]   ;;  %s3300_s3 = inlined_call_operand.vmem [shape: f32[1,128], index: 3, kind: input, shape index: {}]   ;;  %s3301_s4 = inlined_call_operand.vmem [shape: f32[32,128], index: 4, kind: input, shape index: {}]   ;;  %s3302_s5 = inlined_call_operand.hbm [shape: f32[32,128], index: 5, kind: input, shape index: {}]   ;;  %s3303_s6 = inlined_call_operand.vmem [shape: f32[1,128], index: 6, kind: input, shape index: {}]   ;;  %s3304_s7 = inlined_call_operand.hbm [shape: f32[2,2,32], index: 7, kind: input, shape index: {}]   ;;  %s3305_s8 = inlined_call_operand.hbm [shape: f32[2,2,32], index: 8, kind: input, shape index: {}]   ;;  %s3306_s9 = inlined_call_operand.vmem [shape: f32[32,4], index: 9, kind: input, shape index: {}]   ;;  %s3307_s10 = inlined_call_operand.hbm [shape: f32[1,4], index: 10, kind: input, shape index: {}]   ;;  %s3308_s11 = inlined_call_operand.vmem [shape: f32[16,4], index: 11, kind: output, shape index: {0}]   ;;  %s3309_s12 = inlined_call_operand.hbm [shape: f32[2,2,32], index: 12, kind: output, shape index: {1}]   ;;  %s3310_s13 = inlined_call_operand.hbm [shape: f32[2,2,32], index: 13, kind: output, shape index: {2}]  }
   0x1   :  { %20 = vsyncpa [#allocation6], 0 }
   0x2   :  { %21 = vsyncpa [#allocation9], 0 }
   0x3   :  { %22 = vsyncpa [#allocation4], 0 }
   0x4   :  { %23 = vsyncpa [#allocation12], 0  ;;  %s2781_s25 = smov [#allocation5]  }
   0x5   :  { %s53_s26 = sshll.u32 %s2781_s25, 4  ;;  %s54_s26 = int_to_ptr.vmem [resolvable:$true] %s53_s26 }
   0x6   :  { %s2659_s27 = scalar_lea.vmem %s54_s26, 64  ;;  %p2664_p1 = scmp.lt.s32.totalorder %s54_s26, %s54_s26 }
   0x7   :  { %p2660_p0 = scmp.ne.s32.totalorder %s54_s26, %s2659_s27  ;;  %p2665_p2 = scmp.lt.s32.totalorder %s2659_s27, %s2659_s27 }
   0x9   :  { %p2666_p3 = por %p2665_p2, %p2664_p1 }
   0xb   :  { %p2667_p4 = pnand %p2666_p3, %p2660_p0 }
   0xd   :  { %2670 = shalt.err (!%p2667_p4)
}
   0xe   :  { %s2782_s28 = smov 32   ;;  %s2783_s29 = smov 2  }
   0xf   :  { %59 = dma.hbm_to_vmem [thread:$0]  %s3304_s7, 64, %s54_s26, [#allocation6], %s2782_s28, %s2782_s28, %s2783_s29  }
  0x10   :  { %s2784_s15 = smov [#allocation2]  }
  0x11   :  { %s39_s16 = sshll.u32 %s2784_s15, 4  ;;  %s40_s16 = int_to_ptr.vmem [resolvable:$true] %s39_s16 }
  0x12   :  { %s2679_s17 = scalar_lea.vmem %s40_s16, 512  ;;  %p2684_p6 = scmp.lt.s32.totalorder %s40_s16, %s40_s16 }
  0x13   :  { %p2680_p5 = scmp.ne.s32.totalorder %s40_s16, %s2679_s17  ;;  %p2685_p7 = scmp.lt.s32.totalorder %s2679_s17, %s2679_s17 }
  0x15   :  { %p2686_p8 = por %p2685_p7, %p2684_p6 }
  0x17   :  { %p2687_p9 = pnand %p2686_p8, %p2680_p5 }
  0x19   :  { %2690 = shalt.err (!%p2687_p9)
}
  0x1a   :  { %s2785_s18 = smov 128   ;;  %s2786_s19 = smov 8  }
  0x1b   :  { %45 = dma.hbm_to_vmem [thread:$0]  %s3302_s5, 512, %s40_s16, [#allocation3], %s2785_s18, %s2785_s18, %s2786_s19  }
  0x1c   :  { %s2787_s22 = smov [#allocation7]   ;;  %s2788_s24 = smov [#allocation8]  }
  0x1d   :  { %s65_s23 = sshll.u32 %s2787_s22, 4  ;;  %s80_s7 = sshll.u32 %s2788_s24, 4  ;;  %s66_s23 = int_to_ptr.vmem [resolvable:$true] %s65_s23  ;;  %s81_s7 = int_to_ptr.vmem [resolvable:$true] %s80_s7 }
  0x1e   :  { %s2699_s25 = scalar_lea.vmem %s66_s23, 64  ;;  %p2704_p11 = scmp.lt.s32.totalorder %s66_s23, %s66_s23 }
  0x1f   :  { %p2700_p10 = scmp.ne.s32.totalorder %s66_s23, %s2699_s25  ;;  %p2705_p12 = scmp.lt.s32.totalorder %s2699_s25, %s2699_s25 }
  0x21   :  { %p2706_p13 = por %p2705_p12, %p2704_p11 }
  0x23   :  { %p2707_p0 = pnand %p2706_p13, %p2700_p10 }
  0x25   :  { %2710 = shalt.err (!%p2707_p0)
}
  0x26   :  { %71 = dma.hbm_to_vmem [thread:$0]  %s3305_s8, 64, %s66_s23, [#allocation6], %s2782_s28, %s2782_s28, %s2783_s29  }
  0x27   :  { %s2719_s5 = scalar_lea.vmem %s81_s7, 16  ;;  %s2723_s30 = scalar_lea.vmem %s81_s7, 32 }
  0x28   :  { %p2720_p1 = scmp.ne.s32.totalorder %s81_s7, %s2719_s5  ;;  %p2724_p2 = scmp.lt.s32.totalorder %s81_s7, %s81_s7 }
  0x29   :  { %p2725_p3 = scmp.lt.s32.totalorder %s2723_s30, %s2719_s5 }
  0x2b   :  { %p2726_p4 = por %p2725_p3, %p2724_p2 }
  0x2d   :  { %p2727_p5 = pnand %p2726_p4, %p2720_p1 }
  0x2f   :  { %2730 = shalt.err (!%p2727_p5)
}
  0x30   :  { %83 = dma.hbm_to_vmem [thread:$0]  %s3307_s10, 16, %s81_s7, [#allocation9]  }
  0x31   :  { %2771 = dma.done.wait [#allocation3], 512  }
  0x32   :  { %2772 = vsyncadd [#allocation3], 4294966784 }
  0x33   :  { %2773 = dma.done.wait [#allocation6], 128  }
  0x34   :  { %2774 = vsyncadd [#allocation6], 4294967168 }
  0x35   :  { %2775 = dma.done.wait [#allocation9], 16  }
  0x36   :  { %2776 = vsyncadd [#allocation9], 4294967280  ;;  %v2789_v0 = vmov 0.0   ;;  %vm2790_vm0 = vmmov 0   ;;  %vm117_vm1 = vcmask 1043456   ;;  %vm110_vm2 = vcmask 31744  }
  0x37   :  { %2311 = vmatprep.subr.mxu1 %v2789_v0  ;;  %2319 = vmatprep.mubr.msk.f32.mxu1 %vm2790_vm0, %v2789_v0  ;;  %v98_v1 = vld [vmem:[%s3298_s1] sm:$0xf]  ;;  %v2892_v2 = vld [vmem:[%s3299_s2 + $0x18] sm:$0xff]  ;;  %v97_v4 = vld [vmem:[%s3297_s0 + $0x8] sm:$0xff]  ;;  %vm198_vm3 = vcmask 261120   ;;  %s2791_s26 = smov 64  }
  0x38   :  { %v96_v3 = vld [vmem:[%s3297_s0] sm:$0xff]  ;;  %2306 = vmatprep.subr.msk.mxu0 %vm117_vm1, %v98_v1  ;;  %2312 = vmatpush3.msra.mxu1 %v2892_v2  ;;  %v2905_v5 = vld [vmem:[%s3299_s2 + $0x10] sm:$0xff]  ;;  %v2914_v6 = vld [vmem:[%s3299_s2 + $0x8] sm:$0xff]  ;;  %vm1056_vm4 = vcmask 1041408   ;;  %vm1059_vm5 = vcmask 1045504   ;;  %vm1049_vm6 = vcmask 261126  }
  0x39   :  { %2307 = vmatpush3.msk.msra.mxu0 %vm117_vm1, %v98_v1  ;;  %2308 = vmatprep.mubr.msk.f32.mxu0 %vm110_vm2, %v96_v3  ;;  %v2922_v7 = vld [vmem:[%s3299_s2] sm:$0xff]  ;;  %s2792_s1 = smov 96   ;;  %s2794_s0 = smov [#allocation11]  }
  0x3a   :  { %2313 = vmatprep.subr.mxu1 %v2789_v0  ;;  %2309 = vmatmul.mubr.msk.f32.vlgmr.msra.gmra.mxu0 %vm110_vm2, %v97_v4  ;;  %v196_v8 = vld [vmem:[#allocation5] sm:$0x3]  ;;  %v197_v18 = vld [vmem:[#allocation7] sm:$0x3]  ;;  %s2149_s7 = sshll.u32 %s2794_s0, 4  ;;  %s2150_s7 = int_to_ptr.vmem [resolvable:$true] %s2149_s7 }
  0x3b   :  { %2314 = vmatpush3.msra.mxu1 %v2905_v5  ;;  %2322 = vmatprep.subr.mxu0 %v2789_v0  ;;  %v2169_v9 = vld [vmem:[%s3300_s3] ss:$0 sm:$0xff] }
  0x3c   :  { %2315 = vmatprep.subr.mxu1 %v2789_v0  ;;  %2323 = vmatpush3.msra.mxu0 %v2892_v2 }
  0x3d   :  { %2316 = vmatpush3.msra.mxu1 %v2914_v6  ;;  %2324 = vmatprep.subr.mxu0 %v2789_v0 }
  0x3e   :  { %2317 = vmatprep.subr.mxu1 %v2789_v0  ;;  %2325 = vmatpush3.msra.mxu0 %v2905_v5 }
  0x3f   :  { %2318 = vmatpush3.msra.mxu1 %v2922_v7  ;;  %2326 = vmatprep.subr.mxu0 %v2789_v0 }
  0x40   :  { %2320 = vmatmul.mubr.msk.f32.vlgmr.msra.gmra.mxu1 %vm198_vm3, %v196_v8  ;;  %2327 = vmatpush3.msra.mxu0 %v2914_v6 }
  0x41   :  { %2328 = vmatprep.subr.mxu0 %v2789_v0  ;;  %2330 = vmatprep.mubr.msk.f32.mxu0 %vm2790_vm0, %v2789_v0 }
  0x42   :  { %2329 = vmatpush3.msra.mxu0 %v2922_v7  ;;  %2333 = vmatprep.subr.mxu1 %v2789_v0 }
  0x43   :  { %2334 = vmatpush3.msra.mxu1 %v2892_v2  ;;  %2341 = vmatprep.mubr.msk.f32.mxu1 %vm2790_vm0, %v2789_v0 }
  0x44   :  { %2335 = vmatprep.subr.mxu1 %v2789_v0  ;;  %2344 = vmatprep.subr.mxu0 %v2789_v0 }
  0x45   :  { %2336 = vmatpush3.msra.mxu1 %v2905_v5 }
  0x46   :  { %2337 = vmatprep.subr.mxu1 %v2789_v0 }
  0x47   :  { %2338 = vmatpush3.msra.mxu1 %v2914_v6 }
  0x48   :  { %2339 = vmatprep.subr.mxu1 %v2789_v0 }
  0x49   :  { %2340 = vmatpush3.msra.mxu1 %v2922_v7 }
  0x4a   :  { %2355 = vmatprep.subr.mxu1 %v2789_v0 }
  0xfa   :  { %v2310_v10 = vpop.f32.mrf.mxu0 }
  0xfb   :  { %v2952_v11 = vadd.f32 %v2310_v10, %v2169_v9 }
  0xfc   :  { %v187_v12 = vpop.f32.mrf.mxu0 }
  0xfd   :  { %v2954_v13 = vadd.f32 %v2169_v9, %v187_v12 }
 0x100   :  { %v268_v14 = vpop.f32.mrf.mxu1 }
 0x101   :  { %v272_v15 = vadd.f32 %v268_v14, %v2954_v13 }
 0x102   :  { %v2321_v16 = vpop.f32.mrf.mxu1 }
 0x103   :  { %2523 = vtanh.f32 %v272_v15  ;;  %v2174_v19 = vmul.f32 -1.442695, %v272_v15 }
 0x105   :  { %2525 = vpow2.f32 %v2174_v19 }
 0x110   :  { %v2524_v17 = vpop.eup %2523 }
 0x111   :  { %286 = vrot.lane.b32.xlu0 %v2524_v17, %s2791_s26 }
 0x112   :  { %v2526_v20 = vpop.eup %2525 }
 0x113   :  { %v276_v21 = vadd.f32 1.0, %v2526_v20 }
 0x115   :  { %281 = vrot.lane.b32.xlu0 %v197_v18, %s2782_s28  ;;  %2527 = vrcp.f32 %v276_v21 }
 0x122   :  { %v2528_v22 = vpop.eup %2527 }
 0x183   :  { %v287_v23 = vpop.permute.xlu0 %286 }
 0x184   :  { %v289_v24 = vmul.f32 %v2528_v22, %v287_v23 }
 0x186   :  { %291 = vrot.lane.b32.xlu1 %v289_v24, %s2782_s28 }
 0x187   :  { %v282_v25 = vpop.permute.xlu0 %281 }
 0x188   :  { %v284_v26 = vmul.f32 %v2528_v22, %v282_v25 }
 0x1f8   :  { %v292_v27 = vpop.permute.xlu1 %291 }
 0x1f9   :  { %v294_v28 = vadd.f32 %v292_v27, %v284_v26 }
 0x1fb   :  { %2529 = vtanh.f32 %v294_v28  ;;  %v388_v44 = vrot.slane %v294_v28, 6 }
 0x208   :  { %v2530_v29 = vpop.eup %2529 }
 0x209   :  { %297 = vrot.lane.b32.xlu1 %v2530_v29, %s2791_s26 }
 0x27b   :  { %v298_v30 = vpop.permute.xlu1 %297 }
 0x27c   :  { %v2961_v31 = vmul.f32 %v2528_v22, %v298_v30 }
 0x27e   :  { %302 = vrot.lane.b32.xlu0 %v2961_v31, %s2782_s28 }
 0x2f0   :  { %v303_v32 = vpop.permute.xlu0 %302 }
 0x2f1   :  { %2331 = vmatmul.mubr.msk.f32.vlgmr.msra.gmra.mxu0 %vm198_vm3, %v303_v32 }
 0x2f2   :  { %2345 = vmatpush3.msra.mxu0 %v2892_v2  ;;  %2352 = vmatprep.mubr.msk.f32.mxu0 %vm2790_vm0, %v2789_v0 }
 0x2f3   :  { %2346 = vmatprep.subr.mxu0 %v2789_v0 }
 0x2f4   :  { %2347 = vmatpush3.msra.mxu0 %v2905_v5 }
 0x2f5   :  { %2348 = vmatprep.subr.mxu0 %v2789_v0 }
 0x2f6   :  { %2349 = vmatpush3.msra.mxu0 %v2914_v6 }
 0x2f7   :  { %2350 = vmatprep.subr.mxu0 %v2789_v0 }
 0x2f8   :  { %2351 = vmatpush3.msra.mxu0 %v2922_v7 }
 0x2f9   :  { %2366 = vmatprep.subr.mxu0 %v2789_v0 }
 0x3b1   :  { %v372_v33 = vpop.f32.mrf.mxu0 }
 0x3b2   :  { %v377_v34 = vrot.slane %v372_v33, 6 }
 0x3b3   :  { %v2332_v35 = vpop.f32.mrf.mxu0 }
 0x3b4   :  { %v379_v36 = vadd.f32 %v377_v34, %v2954_v13 }
 0x3b6   :  { %2531 = vtanh.f32 %v379_v36  ;;  %v2176_v38 = vmul.f32 -1.442695, %v379_v36 }
 0x3b8   :  { %2533 = vpow2.f32 %v2176_v38 }
 0x3c3   :  { %v2532_v37 = vpop.eup %2531 }
 0x3c4   :  { %392 = vrot.lane.b32.xlu1 %v2532_v37, %s2791_s26 }
 0x3c5   :  { %v2534_v39 = vpop.eup %2533 }
 0x3c6   :  { %v383_v40 = vadd.f32 1.0, %v2534_v39 }
 0x3c8   :  { %2535 = vrcp.f32 %v383_v40 }
 0x3d5   :  { %v2536_v41 = vpop.eup %2535 }
 0x3d6   :  { %v390_v45 = vmul.f32 %v2536_v41, %v388_v44 }
 0x436   :  { %v393_v42 = vpop.permute.xlu1 %392 }
 0x437   :  { %v395_v43 = vmul.f32 %v2536_v41, %v393_v42 }
 0x439   :  { %397 = vrot.lane.b32.xlu0 %v395_v43, %s2782_s28 }
 0x4ab   :  { %v398_v46 = vpop.permute.xlu0 %397 }
 0x4ac   :  { %v400_v47 = vadd.f32 %v398_v46, %v390_v45 }
 0x4ae   :  { %2537 = vtanh.f32 %v400_v47  ;;  %v495_v1 = vrot.slane %v400_v47, 6 }
 0x4bb   :  { %v2538_v48 = vpop.eup %2537 }
 0x4bc   :  { %403 = vrot.lane.b32.xlu1 %v2538_v48, %s2791_s26 }
 0x52e   :  { %v404_v49 = vpop.permute.xlu1 %403 }
 0x52f   :  { %v406_v50 = vmul.f32 %v2536_v41, %v404_v49 }
 0x531   :  { %v408_v51 = vrot.slane %v406_v50, 2  ;;  %v1057_v14 = vsel %vm1056_vm4, %v2961_v31, %v406_v50 }
 0x533   :  { %409 = vrot.lane.b32.xlu0 %v408_v51, %s2782_s28 }
 0x5a5   :  { %v410_v52 = vpop.permute.xlu0 %409 }
 0x5a6   :  { %2342 = vmatmul.mubr.msk.f32.vlgmr.msra.gmra.mxu1 %vm198_vm3, %v410_v52 }
 0x5a7   :  { %2356 = vmatpush3.msra.mxu1 %v2892_v2  ;;  %2363 = vmatprep.mubr.msk.f32.mxu1 %vm2790_vm0, %v2789_v0 }
 0x5a8   :  { %2357 = vmatprep.subr.mxu1 %v2789_v0 }
 0x5a9   :  { %2358 = vmatpush3.msra.mxu1 %v2905_v5 }
 0x5aa   :  { %2359 = vmatprep.subr.mxu1 %v2789_v0 }
 0x5ab   :  { %2360 = vmatpush3.msra.mxu1 %v2914_v6 }
 0x5ac   :  { %2361 = vmatprep.subr.mxu1 %v2789_v0 }
 0x5ad   :  { %2362 = vmatpush3.msra.mxu1 %v2922_v7 }
 0x5ae   :  { %2377 = vmatprep.subr.mxu1 %v2789_v0 }
 0x666   :  { %v479_v53 = vpop.f32.mrf.mxu1 }
 0x667   :  { %v484_v54 = vrot.slane %v479_v53, 4 }
 0x668   :  { %v2343_v55 = vpop.f32.mrf.mxu1 }
 0x669   :  { %v486_v56 = vadd.f32 %v484_v54, %v2954_v13 }
 0x66b   :  { %2539 = vtanh.f32 %v486_v56  ;;  %v2178_v58 = vmul.f32 -1.442695, %v486_v56 }
 0x66d   :  { %2541 = vpow2.f32 %v2178_v58 }
 0x678   :  { %v2540_v57 = vpop.eup %2539 }
 0x679   :  { %499 = vrot.lane.b32.xlu1 %v2540_v57, %s2791_s26 }
 0x67a   :  { %v2542_v59 = vpop.eup %2541 }
 0x67b   :  { %v490_v60 = vadd.f32 1.0, %v2542_v59 }
 0x67d   :  { %2543 = vrcp.f32 %v490_v60 }
 0x68a   :  { %v2544_v61 = vpop.eup %2543 }
 0x68b   :  { %v497_v3 = vmul.f32 %v2544_v61, %v495_v1 }
 0x6eb   :  { %v500_v62 = vpop.permute.xlu1 %499 }
 0x6ec   :  { %v502_v63 = vmul.f32 %v2544_v61, %v500_v62 }
 0x6ee   :  { %504 = vrot.lane.b32.xlu0 %v502_v63, %s2782_s28 }
 0x760   :  { %v505_v4 = vpop.permute.xlu0 %504 }
 0x761   :  { %v507_v8 = vadd.f32 %v505_v4, %v497_v3 }
 0x763   :  { %2545 = vtanh.f32 %v507_v8  ;;  %v602_v29 = vrot.slane %v507_v8, 6 }
 0x770   :  { %v2546_v9 = vpop.eup %2545 }
 0x771   :  { %510 = vrot.lane.b32.xlu1 %v2546_v9, %s2791_s26 }
 0x7e3   :  { %v511_v10 = vpop.permute.xlu1 %510 }
 0x7e4   :  { %v513_v12 = vmul.f32 %v2544_v61, %v511_v10 }
 0x7e6   :  { %v515_v15 = vrot.slane %v513_v12, 4  ;;  %v1058_v16 = vsel %vm117_vm1, %v1057_v14, %v513_v12 }
 0x7e8   :  { %516 = vrot.lane.b32.xlu0 %v515_v15, %s2782_s28 }
 0x85a   :  { %v517_v17 = vpop.permute.xlu0 %516 }
 0x85b   :  { %2353 = vmatmul.mubr.msk.f32.vlgmr.msra.gmra.mxu0 %vm198_vm3, %v517_v17 }
 0x85c   :  { %2367 = vmatpush3.msra.mxu0 %v2892_v2  ;;  %2374 = vmatprep.mubr.msk.f32.mxu0 %vm2790_vm0, %v2789_v0 }
 0x85d   :  { %2368 = vmatprep.subr.mxu0 %v2789_v0 }
 0x85e   :  { %2369 = vmatpush3.msra.mxu0 %v2905_v5 }
 0x85f   :  { %2370 = vmatprep.subr.mxu0 %v2789_v0 }
 0x860   :  { %2371 = vmatpush3.msra.mxu0 %v2914_v6 }
 0x861   :  { %2372 = vmatprep.subr.mxu0 %v2789_v0 }
 0x862   :  { %2373 = vmatpush3.msra.mxu0 %v2922_v7 }
 0x863   :  { %2388 = vmatprep.subr.mxu0 %v2789_v0 }
 0x91b   :  { %v586_v18 = vpop.f32.mrf.mxu0 }
 0x91c   :  { %v591_v19 = vrot.slane %v586_v18, 2 }
 0x91d   :  { %v2354_v20 = vpop.f32.mrf.mxu0 }
 0x91e   :  { %v593_v21 = vadd.f32 %v591_v19, %v2954_v13 }
 0x920   :  { %2547 = vtanh.f32 %v593_v21  ;;  %v2180_v23 = vmul.f32 -1.442695, %v593_v21 }
 0x922   :  { %2549 = vpow2.f32 %v2180_v23 }
 0x92d   :  { %v2548_v22 = vpop.eup %2547 }
 0x92e   :  { %606 = vrot.lane.b32.xlu1 %v2548_v22, %s2791_s26 }
 0x92f   :  { %v2550_v24 = vpop.eup %2549 }
 0x930   :  { %v597_v25 = vadd.f32 1.0, %v2550_v24 }
 0x932   :  { %2551 = vrcp.f32 %v597_v25 }
 0x93f   :  { %v2552_v26 = vpop.eup %2551 }
 0x940   :  { %v604_v30 = vmul.f32 %v2552_v26, %v602_v29 }
 0x9a0   :  { %v607_v27 = vpop.permute.xlu1 %606 }
 0x9a1   :  { %v609_v28 = vmul.f32 %v2552_v26, %v607_v27 }
 0x9a3   :  { %611 = vrot.lane.b32.xlu0 %v609_v28, %s2782_s28 }
 0xa15   :  { %v612_v31 = vpop.permute.xlu0 %611 }
 0xa16   :  { %v614_v32 = vadd.f32 %v612_v31, %v604_v30 }
 0xa18   :  { %2553 = vtanh.f32 %v614_v32  ;;  %v706_v48 = vrot.slane %v614_v32, 6 }
 0xa25   :  { %v2554_v13 = vpop.eup %2553 }
 0xa26   :  { %617 = vrot.lane.b32.xlu1 %v2554_v13, %s2791_s26 }
 0xa98   :  { %v618_v33 = vpop.permute.xlu1 %617 }
 0xa99   :  { %v620_v34 = vmul.f32 %v2552_v26, %v618_v33 }
 0xa9b   :  { %v622_v35 = vrot.slane %v620_v34, 6  ;;  %v3016_v36 = vsel %vm1059_vm5, %v1058_v16, %v620_v34 }
 0xa9d   :  { %623 = vrot.lane.b32.xlu0 %v622_v35, %s2782_s28 }
 0xb0f   :  { %v624_v37 = vpop.permute.xlu0 %623 }
 0xb10   :  { %2364 = vmatmul.mubr.msk.f32.vlgmr.msra.gmra.mxu1 %vm198_vm3, %v624_v37 }
 0xb11   :  { %2378 = vmatpush3.msra.mxu1 %v2892_v2  ;;  %2385 = vmatprep.mubr.msk.f32.mxu1 %vm2790_vm0, %v2789_v0 }
 0xb12   :  { %2379 = vmatprep.subr.mxu1 %v2789_v0 }
 0xb13   :  { %2380 = vmatpush3.msra.mxu1 %v2905_v5 }
 0xb14   :  { %2381 = vmatprep.subr.mxu1 %v2789_v0 }
 0xb15   :  { %2382 = vmatpush3.msra.mxu1 %v2914_v6 }
 0xb16   :  { %2383 = vmatprep.subr.mxu1 %v2789_v0 }
 0xb17   :  { %2384 = vmatpush3.msra.mxu1 %v2922_v7 }
 0xbd0   :  { %v693_v38 = vpop.f32.mrf.mxu1 }
 0xbd1   :  { %v697_v39 = vadd.f32 %v693_v38, %v2952_v11 }
 0xbd2   :  { %v2365_v40 = vpop.f32.mrf.mxu1 }
 0xbd3   :  { %2555 = vtanh.f32 %v697_v39  ;;  %v2182_v42 = vmul.f32 -1.442695, %v697_v39 }
 0xbd5   :  { %2557 = vpow2.f32 %v2182_v42 }
 0xbe0   :  { %v2556_v41 = vpop.eup %2555 }
 0xbe1   :  { %710 = vrot.lane.b32.xlu1 %v2556_v41, %s2791_s26 }
 0xbe2   :  { %v2558_v43 = vpop.eup %2557 }
 0xbe3   :  { %v701_v44 = vadd.f32 1.0, %v2558_v43 }
 0xbe5   :  { %2559 = vrcp.f32 %v701_v44 }
 0xbf2   :  { %v2560_v45 = vpop.eup %2559 }
 0xbf3   :  { %v708_v49 = vmul.f32 %v2560_v45, %v706_v48 }
 0xc53   :  { %v711_v46 = vpop.permute.xlu1 %710 }
 0xc54   :  { %v713_v47 = vmul.f32 %v2560_v45, %v711_v46 }
 0xc56   :  { %715 = vrot.lane.b32.xlu0 %v713_v47, %s2782_s28 }
 0xcc8   :  { %v716_v50 = vpop.permute.xlu0 %715 }
 0xcc9   :  { %v718_v51 = vadd.f32 %v716_v50, %v708_v49 }
 0xccb   :  { %2561 = vtanh.f32 %v718_v51 }
 0xcd8   :  { %v2562_v52 = vpop.eup %2561 }
 0xcd9   :  { %721 = vrot.lane.b32.xlu1 %v2562_v52, %s2791_s26  ;;  %v1067_v52 = vld [vmem:[%s3301_s4 + $0x18] sm:$0xff] }
 0xcda   :  { %2399 = vmatprep.subr.mxu1 %v1067_v52 }
 0xd4b   :  { %v722_v53 = vpop.permute.xlu1 %721 }
 0xd4c   :  { %v3033_v54 = vmul.f32 %v2560_v45, %v722_v53  ;;  %v1066_v53 = vld [vmem:[%s3301_s4 + $0x10] sm:$0xff] }
 0xd4e   :  { %726 = vrot.lane.b32.xlu0 %v3033_v54, %s2782_s28 }
 0xdc0   :  { %v727_v55 = vpop.permute.xlu0 %726 }
 0xdc1   :  { %2375 = vmatmul.mubr.msk.f32.vlgmr.msra.gmra.mxu0 %vm198_vm3, %v727_v55  ;;  %v1065_v55 = vld [vmem:[%s3301_s4 + $0x8] sm:$0xff] }
 0xdc2   :  { %2389 = vmatpush3.msra.mxu0 %v2892_v2  ;;  %2396 = vmatprep.mubr.msk.f32.mxu0 %vm2790_vm0, %v2789_v0 }
 0xdc3   :  { %2390 = vmatprep.subr.mxu0 %v2789_v0 }
 0xdc4   :  { %2391 = vmatpush3.msra.mxu0 %v2905_v5 }
 0xdc5   :  { %2392 = vmatprep.subr.mxu0 %v2789_v0 }
 0xdc6   :  { %2393 = vmatpush3.msra.mxu0 %v2914_v6 }
 0xdc7   :  { %2394 = vmatprep.subr.mxu0 %v2789_v0 }
 0xdc8   :  { %2395 = vmatpush3.msra.mxu0 %v2922_v7  ;;  %v812_v7 = vrot.slane %v718_v51, 6 }
 0xdc9   :  { %2410 = vmatprep.subr.mxu0 %v2789_v0 }
 0xe81   :  { %v796_v56 = vpop.f32.mrf.mxu0 }
 0xe82   :  { %v801_v57 = vrot.slane %v796_v56, 6  ;;  %v3091_v56 = vld [vmem:[#allocation2 + $0x8] sm:$0xff] }
 0xe83   :  { %v2376_v2 = vpop.f32.mrf.mxu0 }
 0xe84   :  { %v803_v58 = vadd.f32 %v801_v57, %v2952_v11  ;;  %v1064_v57 = vld [vmem:[%s3301_s4] sm:$0xff] }
 0xe86   :  { %2563 = vtanh.f32 %v803_v58  ;;  %v2184_v5 = vmul.f32 -1.442695, %v803_v58  ;;  %v3102_v58 = vld [vmem:[#allocation2] sm:$0xff] }
 0xe88   :  { %2565 = vpow2.f32 %v2184_v5 }
 0xe93   :  { %v2564_v59 = vpop.eup %2563 }
 0xe94   :  { %816 = vrot.lane.b32.xlu1 %v2564_v59, %s2791_s26  ;;  %v1165_v59 = vld [vmem:[#allocation5 + $0x2] sm:$0x3] }
 0xe95   :  { %v2566_v60 = vpop.eup %2565 }
 0xe96   :  { %v807_v61 = vadd.f32 1.0, %v2566_v60 }
 0xe98   :  { %2567 = vrcp.f32 %v807_v61 }
 0xea5   :  { %v2568_v6 = vpop.eup %2567 }
 0xea6   :  { %v814_v1 = vmul.f32 %v2568_v6, %v812_v7 }
 0xf06   :  { %v817_v62 = vpop.permute.xlu1 %816 }
 0xf07   :  { %v819_v63 = vmul.f32 %v2568_v6, %v817_v62 }
 0xf09   :  { %821 = vrot.lane.b32.xlu0 %v819_v63, %s2782_s28 }
 0xf7b   :  { %v822_v3 = vpop.permute.xlu0 %821 }
 0xf7c   :  { %v824_v4 = vadd.f32 %v822_v3, %v814_v1  ;;  %v2189_v1 = vld [vmem:[%s3303_s6] ss:$0 sm:$0xff] }
 0xf7e   :  { %2569 = vtanh.f32 %v824_v4  ;;  %v919_v26 = vrot.slane %v824_v4, 6 }
 0xf8b   :  { %v2570_v8 = vpop.eup %2569 }
 0xf8c   :  { %827 = vrot.lane.b32.xlu1 %v2570_v8, %s2791_s26 }
 0xffe   :  { %v828_v9 = vpop.permute.xlu1 %827 }
 0xfff   :  { %v830_v10 = vmul.f32 %v2568_v6, %v828_v9  ;;  %v1167_v6 = vld [vmem:[#allocation7 + $0x2] sm:$0x3] }
0x1001   :  { %v832_v12 = vrot.slane %v830_v10, 2  ;;  %v1061_v13 = vsel %vm1056_vm4, %v3033_v54, %v830_v10  ;;  %v3082_v54 = vld [vmem:[#allocation2 + $0x18] sm:$0xff] }
0x1003   :  { %833 = vrot.lane.b32.xlu0 %v832_v12, %s2782_s28 }
0x1075   :  { %v834_v14 = vpop.permute.xlu0 %833 }
0x1076   :  { %2386 = vmatmul.mubr.msk.f32.vlgmr.msra.gmra.mxu1 %vm198_vm3, %v834_v14 }
0x1077   :  { %2400 = vmatpush3.msra.mxu1 %v1067_v52 }
0x1078   :  { %2401 = vmatprep.subr.mxu1 %v1066_v53 }
0x1079   :  { %2402 = vmatpush3.msra.mxu1 %v1066_v53 }
0x107a   :  { %2403 = vmatprep.subr.mxu1 %v1065_v55 }
0x107b   :  { %2404 = vmatpush3.msra.mxu1 %v1065_v55 }
0x107c   :  { %2405 = vmatprep.subr.mxu1 %v1064_v57 }
0x107d   :  { %2406 = vmatpush3.msra.mxu1 %v1064_v57 }
0x107e   :  { %2421 = vmatprep.subr.mxu1 %v2789_v0 }
0x1136   :  { %v903_v15 = vpop.f32.mrf.mxu1 }
0x1137   :  { %v908_v16 = vrot.slane %v903_v15, 4 }
0x1138   :  { %v2387_v17 = vpop.f32.mrf.mxu1 }
0x1139   :  { %v910_v18 = vadd.f32 %v908_v16, %v2952_v11 }
0x113b   :  { %2571 = vtanh.f32 %v910_v18  ;;  %v2186_v20 = vmul.f32 -1.442695, %v910_v18 }
0x113d   :  { %2573 = vpow2.f32 %v2186_v20 }
0x1148   :  { %v2572_v19 = vpop.eup %2571 }
0x1149   :  { %923 = vrot.lane.b32.xlu1 %v2572_v19, %s2791_s26 }
0x114a   :  { %v2574_v21 = vpop.eup %2573 }
0x114b   :  { %v914_v22 = vadd.f32 1.0, %v2574_v21 }
0x114d   :  { %2575 = vrcp.f32 %v914_v22 }
0x115a   :  { %v2576_v23 = vpop.eup %2575 }
0x115b   :  { %v921_v27 = vmul.f32 %v2576_v23, %v919_v26 }
0x11bb   :  { %v924_v24 = vpop.permute.xlu1 %923 }
0x11bc   :  { %v926_v25 = vmul.f32 %v2576_v23, %v924_v24 }
0x11be   :  { %928 = vrot.lane.b32.xlu0 %v926_v25, %s2782_s28 }
0x1230   :  { %v929_v28 = vpop.permute.xlu0 %928 }
0x1231   :  { %v931_v29 = vadd.f32 %v929_v28, %v921_v27 }
0x1233   :  { %2577 = vtanh.f32 %v931_v29  ;;  %v1026_v48 = vrot.slane %v931_v29, 6 }
0x1240   :  { %v2578_v30 = vpop.eup %2577 }
0x1241   :  { %934 = vrot.lane.b32.xlu1 %v2578_v30, %s2791_s26 }
0x12b3   :  { %v935_v31 = vpop.permute.xlu1 %934 }
0x12b4   :  { %v937_v32 = vmul.f32 %v2576_v23, %v935_v31 }
0x12b6   :  { %v939_v33 = vrot.slane %v937_v32, 4  ;;  %v3061_v34 = vsel %vm117_vm1, %v1061_v13, %v937_v32 }
0x12b8   :  { %940 = vrot.lane.b32.xlu0 %v939_v33, %s2782_s28 }
0x132a   :  { %v941_v35 = vpop.permute.xlu0 %940 }
0x132b   :  { %2397 = vmatmul.mubr.msk.f32.vlgmr.msra.gmra.mxu0 %vm198_vm3, %v941_v35 }
0x132c   :  { %2418 = vmatprep.mubr.msk.f32.mxu0 %vm2790_vm0, %v2789_v0  ;;  %2411 = vmatpush3.msra.mxu0 %v3082_v54 }
0x132d   :  { %2412 = vmatprep.subr.mxu0 %v2789_v0 }
0x13eb   :  { %v1010_v37 = vpop.f32.mrf.mxu0 }
0x13ec   :  { %v1015_v38 = vrot.slane %v1010_v37, 2 }
0x13ed   :  { %v2398_v39 = vpop.f32.mrf.mxu0 }
0x13ee   :  { %v1017_v40 = vadd.f32 %v1015_v38, %v2952_v11 }
0x13f0   :  { %2579 = vtanh.f32 %v1017_v40  ;;  %v2188_v42 = vmul.f32 -1.442695, %v1017_v40 }
0x13f2   :  { %2581 = vpow2.f32 %v2188_v42 }
0x13fd   :  { %v2580_v41 = vpop.eup %2579 }
0x13fe   :  { %1030 = vrot.lane.b32.xlu1 %v2580_v41, %s2791_s26 }
0x13ff   :  { %v2582_v43 = vpop.eup %2581 }
0x1400   :  { %v1021_v44 = vadd.f32 1.0, %v2582_v43 }
0x1402   :  { %2583 = vrcp.f32 %v1021_v44 }
0x140f   :  { %v2584_v45 = vpop.eup %2583 }
0x1410   :  { %v1028_v49 = vmul.f32 %v2584_v45, %v1026_v48 }
0x1470   :  { %v1031_v46 = vpop.permute.xlu1 %1030 }
0x1471   :  { %v1033_v47 = vmul.f32 %v2584_v45, %v1031_v46 }
0x1473   :  { %1035 = vrot.lane.b32.xlu0 %v1033_v47, %s2782_s28 }
0x1477   :  { %1081 = vrot.lane.b32.xlu0 %v3016_v36, %s2782_s28  ;;  %v3085_v36 = vld [vmem:[#allocation2 + $0x10] sm:$0xff] }
0x1478   :  { %2413 = vmatpush3.msra.mxu0 %v3085_v36 }
0x1479   :  { %2414 = vmatprep.subr.mxu0 %v2789_v0 }
0x147a   :  { %2415 = vmatpush3.msra.mxu0 %v3091_v56 }
0x147b   :  { %2416 = vmatprep.subr.mxu0 %v2789_v0 }
0x147c   :  { %2417 = vmatpush3.msra.mxu0 %v3102_v58 }
0x147d   :  { %2419 = vmatmul.mubr.msk.f32.vlgmr.msra.gmra.mxu0 %vm198_vm3, %v1165_v59  ;;  %2432 = vmatprep.subr.mxu0 %v2789_v0 }
0x147e   :  { %2433 = vmatpush3.msra.mxu0 %v3082_v54  ;;  %2440 = vmatprep.mubr.msk.f32.mxu0 %vm2790_vm0, %v2789_v0 }
0x147f   :  { %2434 = vmatprep.subr.mxu0 %v2789_v0 }
0x1480   :  { %2435 = vmatpush3.msra.mxu0 %v3085_v36 }
0x1481   :  { %2436 = vmatprep.subr.mxu0 %v2789_v0 }
0x1482   :  { %2437 = vmatpush3.msra.mxu0 %v3091_v56 }
0x1483   :  { %2438 = vmatprep.subr.mxu0 %v2789_v0 }
0x1484   :  { %2439 = vmatpush3.msra.mxu0 %v3102_v58 }
0x1485   :  { %2454 = vmatprep.subr.mxu0 %v2789_v0 }
0x14e5   :  { %v1036_v11 = vpop.permute.xlu0 %1035 }
0x14e6   :  { %v3072_v50 = vadd.f32 %v1036_v11, %v1028_v49 }
0x14e8   :  { %2585 = vtanh.f32 %v3072_v50 }
0x14e9   :  { %v1082_v51 = vpop.permute.xlu0 %1081 }
0x14ea   :  { %2407 = vmatprep.mubr.msk.f32.mxu1 %vm198_vm3, %v1082_v51 }
0x14f5   :  { %v2586_v2 = vpop.eup %2585 }
0x14f6   :  { %1041 = vrot.lane.b32.xlu1 %v2586_v2, %s2791_s26 }
0x153d   :  { %v1237_v63 = vpop.f32.mrf.mxu0 }
0x153f   :  { %v2420_v7 = vpop.f32.mrf.mxu0 }
0x1568   :  { %v1042_v5 = vpop.permute.xlu1 %1041 }
0x1569   :  { %v3116_v60 = vmul.f32 %v2584_v45, %v1042_v5 }
0x156b   :  { %v1063_v61 = vsel %vm1059_vm5, %v3061_v34, %v3116_v60 }
0x156c   :  { %1083 = vrot.lane.b32.xlu1 %v1063_v61, %s2782_s28 }
0x1570   :  { %1250 = vrot.lane.b32.xlu1 %v1167_v6, %s2782_s28 }
0x15de   :  { %v1084_v62 = vpop.permute.xlu1 %1083 }
0x15df   :  { %2408 = vmatmul.mubr.msk.f32.vlgmr.msra.gmra.mxu1 %vm198_vm3, %v1084_v62 }
0x15e0   :  { %2422 = vmatpush3.msra.mxu1 %v3082_v54  ;;  %2429 = vmatprep.mubr.msk.f32.mxu1 %vm2790_vm0, %v2789_v0 }
0x15e1   :  { %2423 = vmatprep.subr.mxu1 %v2789_v0 }
0x15e2   :  { %2424 = vmatpush3.msra.mxu1 %v3085_v36  ;;  %v1251_v20 = vpop.permute.xlu1 %1250 }
0x15e3   :  { %2425 = vmatprep.subr.mxu1 %v2789_v0 }
0x15e4   :  { %2426 = vmatpush3.msra.mxu1 %v3091_v56 }
0x15e5   :  { %2427 = vmatprep.subr.mxu1 %v2789_v0 }
0x15e6   :  { %2428 = vmatpush3.msra.mxu1 %v3102_v58 }
0x15e7   :  { %2443 = vmatprep.subr.mxu1 %v2789_v0 }
0x169f   :  { %v2409_v3 = vpop.f32.mrf.mxu1 }
0x16a0   :  { %v3138_v4 = vadd.f32 %v2409_v3, %v2189_v1 }
0x16a1   :  { %v1155_v8 = vpop.f32.mrf.mxu1 }
0x16a2   :  { %v3140_v9 = vadd.f32 %v2189_v1, %v1155_v8 }
0x16a4   :  { %v1241_v10 = vadd.f32 %v1237_v63, %v3140_v9 }
0x16a6   :  { %2587 = vtanh.f32 %v1241_v10  ;;  %v2193_v14 = vmul.f32 -1.442695, %v1241_v10 }
0x16a8   :  { %2589 = vpow2.f32 %v2193_v14 }
0x16b3   :  { %v2588_v12 = vpop.eup %2587 }
0x16b4   :  { %1255 = vrot.lane.b32.xlu0 %v2588_v12, %s2791_s26 }
0x16b5   :  { %v2590_v15 = vpop.eup %2589 }
0x16b6   :  { %v1245_v16 = vadd.f32 1.0, %v2590_v15 }
0x16b8   :  { %2591 = vrcp.f32 %v1245_v16 }
0x16c5   :  { %v2592_v17 = vpop.eup %2591 }
0x16c6   :  { %v1253_v21 = vmul.f32 %v2592_v17, %v1251_v20 }
0x1726   :  { %v1256_v18 = vpop.permute.xlu0 %1255 }
0x1727   :  { %v1258_v19 = vmul.f32 %v2592_v17, %v1256_v18 }
0x1729   :  { %1260 = vrot.lane.b32.xlu0 %v1258_v19, %s2782_s28 }
0x179b   :  { %v1261_v22 = vpop.permute.xlu0 %1260 }
0x179c   :  { %v1263_v23 = vadd.f32 %v1261_v22, %v1253_v21 }
0x179e   :  { %2593 = vtanh.f32 %v1263_v23  ;;  %v1357_v39 = vrot.slane %v1263_v23, 6 }
0x17ab   :  { %v2594_v24 = vpop.eup %2593 }
0x17ac   :  { %1266 = vrot.lane.b32.xlu1 %v2594_v24, %s2791_s26 }
0x181e   :  { %v1267_v25 = vpop.permute.xlu1 %1266 }
0x181f   :  { %v3146_v26 = vmul.f32 %v2592_v17, %v1267_v25 }
0x1821   :  { %1271 = vrot.lane.b32.xlu0 %v3146_v26, %s2782_s28 }
0x1893   :  { %v1272_v27 = vpop.permute.xlu0 %1271 }
0x1894   :  { %2430 = vmatmul.mubr.msk.f32.vlgmr.msra.gmra.mxu1 %vm198_vm3, %v1272_v27 }
0x1895   :  { %2444 = vmatpush3.msra.mxu1 %v3082_v54  ;;  %2451 = vmatprep.mubr.msk.f32.mxu1 %vm2790_vm0, %v2789_v0 }
0x1896   :  { %2445 = vmatprep.subr.mxu1 %v2789_v0 }
0x1897   :  { %2446 = vmatpush3.msra.mxu1 %v3085_v36 }
0x1898   :  { %2447 = vmatprep.subr.mxu1 %v2789_v0 }
0x1899   :  { %2448 = vmatpush3.msra.mxu1 %v3091_v56 }
0x189a   :  { %2449 = vmatprep.subr.mxu1 %v2789_v0 }
0x189b   :  { %2450 = vmatpush3.msra.mxu1 %v3102_v58 }
0x189c   :  { %2465 = vmatprep.subr.mxu1 %v2789_v0 }
0x1954   :  { %v1341_v28 = vpop.f32.mrf.mxu1 }
0x1955   :  { %v1346_v29 = vrot.slane %v1341_v28, 6 }
0x1956   :  { %v2431_v30 = vpop.f32.mrf.mxu1 }
0x1957   :  { %v1348_v31 = vadd.f32 %v1346_v29, %v3140_v9 }
0x1959   :  { %2595 = vtanh.f32 %v1348_v31  ;;  %v2195_v13 = vmul.f32 -1.442695, %v1348_v31 }
0x195b   :  { %2597 = vpow2.f32 %v2195_v13 }
0x1966   :  { %v2596_v32 = vpop.eup %2595 }
0x1967   :  { %1361 = vrot.lane.b32.xlu1 %v2596_v32, %s2791_s26 }
0x1968   :  { %v2598_v33 = vpop.eup %2597 }
0x1969   :  { %v1352_v34 = vadd.f32 1.0, %v2598_v33 }
0x196b   :  { %2599 = vrcp.f32 %v1352_v34 }
0x1978   :  { %v2600_v35 = vpop.eup %2599 }
0x1979   :  { %v1359_v40 = vmul.f32 %v2600_v35, %v1357_v39 }
0x19d9   :  { %v1362_v37 = vpop.permute.xlu1 %1361 }
0x19da   :  { %v1364_v38 = vmul.f32 %v2600_v35, %v1362_v37 }
0x19dc   :  { %1366 = vrot.lane.b32.xlu0 %v1364_v38, %s2782_s28 }
0x1a4e   :  { %v1367_v41 = vpop.permute.xlu0 %1366 }
0x1a4f   :  { %v1369_v42 = vadd.f32 %v1367_v41, %v1359_v40 }
0x1a51   :  { %2601 = vtanh.f32 %v1369_v42  ;;  %v1464_v61 = vrot.slane %v1369_v42, 6 }
0x1a5e   :  { %v2602_v43 = vpop.eup %2601 }
0x1a5f   :  { %1372 = vrot.lane.b32.xlu1 %v2602_v43, %s2791_s26 }
0x1ad1   :  { %v1373_v44 = vpop.permute.xlu1 %1372 }
0x1ad2   :  { %v1375_v45 = vmul.f32 %v2600_v35, %v1373_v44 }
0x1ad4   :  { %v1377_v46 = vrot.slane %v1375_v45, 2  ;;  %v2026_v8 = vsel %vm1056_vm4, %v3146_v26, %v1375_v45 }
0x1ad6   :  { %1378 = vrot.lane.b32.xlu0 %v1377_v46, %s2782_s28 }
0x1b48   :  { %v1379_v47 = vpop.permute.xlu0 %1378 }
0x1b49   :  { %2441 = vmatmul.mubr.msk.f32.vlgmr.msra.gmra.mxu0 %vm198_vm3, %v1379_v47 }
0x1b4a   :  { %2455 = vmatpush3.msra.mxu0 %v3082_v54  ;;  %2462 = vmatprep.mubr.msk.f32.mxu0 %vm2790_vm0, %v2789_v0 }
0x1b4b   :  { %2456 = vmatprep.subr.mxu0 %v2789_v0 }
0x1b4c   :  { %2457 = vmatpush3.msra.mxu0 %v3085_v36 }
0x1b4d   :  { %2458 = vmatprep.subr.mxu0 %v2789_v0 }
0x1b4e   :  { %2459 = vmatpush3.msra.mxu0 %v3091_v56 }
0x1b4f   :  { %2460 = vmatprep.subr.mxu0 %v2789_v0 }
0x1b50   :  { %2461 = vmatpush3.msra.mxu0 %v3102_v58 }
0x1b51   :  { %2476 = vmatprep.subr.mxu0 %v2789_v0 }
0x1c09   :  { %v1448_v48 = vpop.f32.mrf.mxu0 }
0x1c0a   :  { %v1453_v49 = vrot.slane %v1448_v48, 4 }
0x1c0b   :  { %v2442_v11 = vpop.f32.mrf.mxu0 }
0x1c0c   :  { %v1455_v51 = vadd.f32 %v1453_v49, %v3140_v9 }
0x1c0e   :  { %2603 = vtanh.f32 %v1455_v51  ;;  %v2197_v53 = vmul.f32 -1.442695, %v1455_v51 }
0x1c10   :  { %2605 = vpow2.f32 %v2197_v53 }
0x1c1b   :  { %v2604_v52 = vpop.eup %2603 }
0x1c1c   :  { %1468 = vrot.lane.b32.xlu1 %v2604_v52, %s2791_s26 }
0x1c1d   :  { %v2606_v55 = vpop.eup %2605 }
0x1c1e   :  { %v1459_v57 = vadd.f32 1.0, %v2606_v55 }
0x1c20   :  { %2607 = vrcp.f32 %v1459_v57 }
0x1c2d   :  { %v2608_v2 = vpop.eup %2607 }
0x1c2e   :  { %v1466_v6 = vmul.f32 %v2608_v2, %v1464_v61 }
0x1c8e   :  { %v1469_v59 = vpop.permute.xlu1 %1468 }
0x1c8f   :  { %v1471_v5 = vmul.f32 %v2608_v2, %v1469_v59 }
0x1c91   :  { %1473 = vrot.lane.b32.xlu0 %v1471_v5, %s2782_s28 }
0x1d03   :  { %v1474_v62 = vpop.permute.xlu0 %1473 }
0x1d04   :  { %v1476_v63 = vadd.f32 %v1474_v62, %v1466_v6 }
0x1d06   :  { %2609 = vtanh.f32 %v1476_v63  ;;  %v1571_v26 = vrot.slane %v1476_v63, 6 }
0x1d13   :  { %v2610_v7 = vpop.eup %2609 }
0x1d14   :  { %1479 = vrot.lane.b32.xlu1 %v2610_v7, %s2791_s26 }
0x1d86   :  { %v1480_v1 = vpop.permute.xlu1 %1479 }
0x1d87   :  { %v1482_v3 = vmul.f32 %v2608_v2, %v1480_v1 }
0x1d89   :  { %v1484_v10 = vrot.slane %v1482_v3, 4  ;;  %v2027_v12 = vsel %vm117_vm1, %v2026_v8, %v1482_v3 }
0x1d8b   :  { %1485 = vrot.lane.b32.xlu0 %v1484_v10, %s2782_s28 }
0x1dfd   :  { %v1486_v14 = vpop.permute.xlu0 %1485 }
0x1dfe   :  { %2452 = vmatmul.mubr.msk.f32.vlgmr.msra.gmra.mxu1 %vm198_vm3, %v1486_v14 }
0x1dff   :  { %2466 = vmatpush3.msra.mxu1 %v3082_v54  ;;  %2473 = vmatprep.mubr.msk.f32.mxu1 %vm2790_vm0, %v2789_v0 }
0x1e00   :  { %2467 = vmatprep.subr.mxu1 %v2789_v0 }
0x1e01   :  { %2468 = vmatpush3.msra.mxu1 %v3085_v36 }
0x1e02   :  { %2469 = vmatprep.subr.mxu1 %v2789_v0 }
0x1e03   :  { %2470 = vmatpush3.msra.mxu1 %v3091_v56 }
0x1e04   :  { %2471 = vmatprep.subr.mxu1 %v2789_v0 }
0x1e05   :  { %2472 = vmatpush3.msra.mxu1 %v3102_v58 }
0x1e06   :  { %2487 = vmatprep.subr.mxu1 %v2789_v0 }
0x1ebe   :  { %v1555_v15 = vpop.f32.mrf.mxu1 }
0x1ebf   :  { %v1560_v16 = vrot.slane %v1555_v15, 2 }
0x1ec0   :  { %v2453_v17 = vpop.f32.mrf.mxu1 }
0x1ec1   :  { %v1562_v18 = vadd.f32 %v1560_v16, %v3140_v9 }
0x1ec3   :  { %2611 = vtanh.f32 %v1562_v18  ;;  %v2199_v20 = vmul.f32 -1.442695, %v1562_v18 }
0x1ec5   :  { %2613 = vpow2.f32 %v2199_v20 }
0x1ed0   :  { %v2612_v19 = vpop.eup %2611 }
0x1ed1   :  { %1575 = vrot.lane.b32.xlu1 %v2612_v19, %s2791_s26 }
0x1ed2   :  { %v2614_v21 = vpop.eup %2613 }
0x1ed3   :  { %v1566_v22 = vadd.f32 1.0, %v2614_v21 }
0x1ed5   :  { %2615 = vrcp.f32 %v1566_v22 }
0x1ee2   :  { %v2616_v23 = vpop.eup %2615 }
0x1ee3   :  { %v1573_v27 = vmul.f32 %v2616_v23, %v1571_v26 }
0x1f43   :  { %v1576_v24 = vpop.permute.xlu1 %1575 }
0x1f44   :  { %v1578_v25 = vmul.f32 %v2616_v23, %v1576_v24 }
0x1f46   :  { %1580 = vrot.lane.b32.xlu0 %v1578_v25, %s2782_s28 }
0x1fb8   :  { %v1581_v28 = vpop.permute.xlu0 %1580 }
0x1fb9   :  { %v1583_v29 = vadd.f32 %v1581_v28, %v1573_v27 }
0x1fbb   :  { %2617 = vtanh.f32 %v1583_v29  ;;  %v1675_v45 = vrot.slane %v1583_v29, 6 }
0x1fc8   :  { %v2618_v9 = vpop.eup %2617 }
0x1fc9   :  { %1586 = vrot.lane.b32.xlu1 %v2618_v9, %s2791_s26 }
0x203b   :  { %v1587_v30 = vpop.permute.xlu1 %1586 }
0x203c   :  { %v1589_v31 = vmul.f32 %v2616_v23, %v1587_v30 }
0x203e   :  { %v1591_v32 = vrot.slane %v1589_v31, 6  ;;  %v3201_v13 = vsel %vm1059_vm5, %v2027_v12, %v1589_v31 }
0x2040   :  { %1592 = vrot.lane.b32.xlu0 %v1591_v32, %s2782_s28 }
0x20b2   :  { %v1593_v33 = vpop.permute.xlu0 %1592 }
0x20b3   :  { %2463 = vmatmul.mubr.msk.f32.vlgmr.msra.gmra.mxu0 %vm198_vm3, %v1593_v33 }
0x20b4   :  { %2477 = vmatpush3.msra.mxu0 %v3082_v54  ;;  %2484 = vmatprep.mubr.msk.f32.mxu0 %vm2790_vm0, %v2789_v0 }
0x20b5   :  { %2478 = vmatprep.subr.mxu0 %v2789_v0 }
0x20b6   :  { %2479 = vmatpush3.msra.mxu0 %v3085_v36 }
0x20b7   :  { %2480 = vmatprep.subr.mxu0 %v2789_v0 }
0x20b8   :  { %2481 = vmatpush3.msra.mxu0 %v3091_v56 }
0x20b9   :  { %2482 = vmatprep.subr.mxu0 %v2789_v0 }
0x20ba   :  { %2483 = vmatpush3.msra.mxu0 %v3102_v58 }
0x2173   :  { %v1662_v34 = vpop.f32.mrf.mxu0 }
0x2174   :  { %v1666_v35 = vadd.f32 %v1662_v34, %v3138_v4 }
0x2175   :  { %v2464_v37 = vpop.f32.mrf.mxu0 }
0x2176   :  { %2619 = vtanh.f32 %v1666_v35  ;;  %v2201_v39 = vmul.f32 -1.442695, %v1666_v35 }
0x2178   :  { %2621 = vpow2.f32 %v2201_v39 }
0x2183   :  { %v2620_v38 = vpop.eup %2619 }
0x2184   :  { %1679 = vrot.lane.b32.xlu1 %v2620_v38, %s2791_s26 }
0x2185   :  { %v2622_v40 = vpop.eup %2621 }
0x2186   :  { %v1670_v41 = vadd.f32 1.0, %v2622_v40 }
0x2188   :  { %2623 = vrcp.f32 %v1670_v41 }
0x2195   :  { %v2624_v42 = vpop.eup %2623 }
0x2196   :  { %v1677_v46 = vmul.f32 %v2624_v42, %v1675_v45 }
0x21f6   :  { %v1680_v43 = vpop.permute.xlu1 %1679 }
0x21f7   :  { %v1682_v44 = vmul.f32 %v2624_v42, %v1680_v43 }
0x21f9   :  { %1684 = vrot.lane.b32.xlu0 %v1682_v44, %s2782_s28 }
0x226b   :  { %v1685_v47 = vpop.permute.xlu0 %1684 }
0x226c   :  { %v1687_v48 = vadd.f32 %v1685_v47, %v1677_v46 }
0x226e   :  { %2625 = vtanh.f32 %v1687_v48 }
0x227b   :  { %v2626_v49 = vpop.eup %2625 }
0x227c   :  { %1690 = vrot.lane.b32.xlu1 %v2626_v49, %s2791_s26 }
0x22ee   :  { %v1691_v11 = vpop.permute.xlu1 %1690 }
0x22ef   :  { %v3218_v51 = vmul.f32 %v2624_v42, %v1691_v11 }
0x22f1   :  { %1695 = vrot.lane.b32.xlu0 %v3218_v51, %s2782_s28 }
0x2363   :  { %v1696_v52 = vpop.permute.xlu0 %1695 }
0x2364   :  { %2474 = vmatmul.mubr.msk.f32.vlgmr.msra.gmra.mxu1 %vm198_vm3, %v1696_v52  ;;  %v2033_v52 = vld [vmem:[%s3306_s9 + $0x8] sm:$0xff] }
0x2365   :  { %2488 = vmatpush3.msra.mxu1 %v3082_v54  ;;  %2495 = vmatprep.mubr.msk.f32.mxu1 %vm2790_vm0, %v2789_v0 }
0x2366   :  { %2489 = vmatprep.subr.mxu1 %v2789_v0 }
0x2367   :  { %2490 = vmatpush3.msra.mxu1 %v3085_v36 }
0x2368   :  { %2491 = vmatprep.subr.mxu1 %v2789_v0 }
0x2369   :  { %2492 = vmatpush3.msra.mxu1 %v3091_v56 }
0x236a   :  { %2493 = vmatprep.subr.mxu1 %v2789_v0  ;;  %v1781_v0 = vrot.slane %v1687_v48, 6 }
0x236b   :  { %2494 = vmatpush3.msra.mxu1 %v3102_v58 }
0x2424   :  { %v1765_v53 = vpop.f32.mrf.mxu1 }
0x2425   :  { %v1770_v55 = vrot.slane %v1765_v53, 6  ;;  %v2032_v53 = vld [vmem:[%s3306_s9] sm:$0xff] }
0x2426   :  { %v2475_v57 = vpop.f32.mrf.mxu1 }
0x2427   :  { %v1772_v54 = vadd.f32 %v1770_v55, %v3138_v4 }
0x2429   :  { %2627 = vtanh.f32 %v1772_v54  ;;  %v2203_v59 = vmul.f32 -1.442695, %v1772_v54 }
0x242b   :  { %2629 = vpow2.f32 %v2203_v59 }
0x2436   :  { %v2628_v2 = vpop.eup %2627 }
0x2437   :  { %1785 = vrot.lane.b32.xlu1 %v2628_v2, %s2791_s26 }
0x2438   :  { %v2630_v36 = vpop.eup %2629 }
0x2439   :  { %v1776_v5 = vadd.f32 1.0, %v2630_v36 }
0x243b   :  { %2631 = vrcp.f32 %v1776_v5 }
0x2448   :  { %v2632_v61 = vpop.eup %2631 }
0x2449   :  { %v1783_v58 = vmul.f32 %v2632_v61, %v1781_v0 }
0x24a9   :  { %v1786_v56 = vpop.permute.xlu1 %1785 }
0x24aa   :  { %v1788_v6 = vmul.f32 %v2632_v61, %v1786_v56 }
0x24ac   :  { %1790 = vrot.lane.b32.xlu0 %v1788_v6, %s2782_s28 }
0x251e   :  { %v1791_v62 = vpop.permute.xlu0 %1790 }
0x251f   :  { %v1793_v63 = vadd.f32 %v1791_v62, %v1783_v58 }
0x2521   :  { %2633 = vtanh.f32 %v1793_v63  ;;  %v1888_v24 = vrot.slane %v1793_v63, 6 }
0x252e   :  { %v2634_v7 = vpop.eup %2633 }
0x252f   :  { %1796 = vrot.lane.b32.xlu1 %v2634_v7, %s2791_s26 }
0x25a1   :  { %v1797_v1 = vpop.permute.xlu1 %1796 }
0x25a2   :  { %v1799_v3 = vmul.f32 %v2632_v61, %v1797_v1 }
0x25a4   :  { %v1801_v8 = vrot.slane %v1799_v3, 2  ;;  %v2029_v30 = vsel %vm1056_vm4, %v3218_v51, %v1799_v3  ;;  %v2035_v51 = vld [vmem:[%s3306_s9 + $0x18] sm:$0xff] }
0x25a5   :  { %2498 = vmatprep.subr.mxu0 %v2035_v51 }
0x25a6   :  { %1802 = vrot.lane.b32.xlu0 %v1801_v8, %s2782_s28 }
0x2618   :  { %v1803_v10 = vpop.permute.xlu0 %1802 }
0x2619   :  { %2485 = vmatmul.mubr.msk.f32.vlgmr.msra.gmra.mxu0 %vm198_vm3, %v1803_v10 }
0x261a   :  { %2499 = vmatpush3.msra.mxu0 %v2035_v51 }
0x26d9   :  { %v1872_v12 = vpop.f32.mrf.mxu0 }
0x26da   :  { %v1877_v14 = vrot.slane %v1872_v12, 4 }
0x26db   :  { %v2486_v15 = vpop.f32.mrf.mxu0 }
0x26dc   :  { %v1879_v16 = vadd.f32 %v1877_v14, %v3138_v4 }
0x26de   :  { %2635 = vtanh.f32 %v1879_v16  ;;  %v2205_v18 = vmul.f32 -1.442695, %v1879_v16 }
0x26e0   :  { %2637 = vpow2.f32 %v2205_v18 }
0x26eb   :  { %v2636_v17 = vpop.eup %2635 }
0x26ec   :  { %1892 = vrot.lane.b32.xlu1 %v2636_v17, %s2791_s26 }
0x26ed   :  { %v2638_v19 = vpop.eup %2637 }
0x26ee   :  { %v1883_v20 = vadd.f32 1.0, %v2638_v19 }
0x26f0   :  { %2639 = vrcp.f32 %v1883_v20 }
0x26fd   :  { %v2640_v21 = vpop.eup %2639 }
0x26fe   :  { %v1890_v25 = vmul.f32 %v2640_v21, %v1888_v24 }
0x275e   :  { %v1893_v22 = vpop.permute.xlu1 %1892 }
0x275f   :  { %v1895_v23 = vmul.f32 %v2640_v21, %v1893_v22 }
0x2761   :  { %1897 = vrot.lane.b32.xlu0 %v1895_v23, %s2782_s28 }
0x27d3   :  { %v1898_v26 = vpop.permute.xlu0 %1897 }
0x27d4   :  { %v1900_v27 = vadd.f32 %v1898_v26, %v1890_v25 }
0x27d6   :  { %2641 = vtanh.f32 %v1900_v27 }
0x27e3   :  { %v2642_v28 = vpop.eup %2641 }
0x27e4   :  { %1903 = vrot.lane.b32.xlu1 %v2642_v28, %s2791_s26 }
0x2856   :  { %v1904_v29 = vpop.permute.xlu1 %1903 }
0x2857   :  { %v1906_v9 = vmul.f32 %v2640_v21, %v1904_v29 }
0x2859   :  { %v1908_v31 = vrot.slane %v1906_v9, 4  ;;  %v2030_v32 = vsel %vm117_vm1, %v2029_v30, %v1906_v9 }
0x285b   :  { %1909 = vrot.lane.b32.xlu0 %v1908_v31, %s2782_s28 }
0x28cd   :  { %v1910_v33 = vpop.permute.xlu0 %1909 }
0x28ce   :  { %2496 = vmatmul.mubr.msk.f32.vlgmr.msra.gmra.mxu1 %vm198_vm3, %v1910_v33 }
0x298e   :  { %v1979_v34 = vpop.f32.mrf.mxu1 }
0x298f   :  { %v1984_v35 = vrot.slane %v1979_v34, 2 }
0x2990   :  { %v2497_v37 = vpop.f32.mrf.mxu1 }
0x2991   :  { %v1986_v38 = vadd.f32 %v1984_v35, %v3138_v4  ;;  %v1995_v4 = vrot.slane %v1900_v27, 6 }
0x2993   :  { %2643 = vtanh.f32 %v1986_v38  ;;  %v2207_v40 = vmul.f32 -1.442695, %v1986_v38 }
0x2995   :  { %2645 = vpow2.f32 %v2207_v40 }
0x29a0   :  { %v2644_v39 = vpop.eup %2643 }
0x29a1   :  { %1999 = vrot.lane.b32.xlu1 %v2644_v39, %s2791_s26 }
0x29a2   :  { %v2646_v41 = vpop.eup %2645 }
0x29a3   :  { %v1990_v42 = vadd.f32 1.0, %v2646_v41 }
0x29a5   :  { %2647 = vrcp.f32 %v1990_v42 }
0x29b2   :  { %v2648_v43 = vpop.eup %2647 }
0x29b3   :  { %v1997_v46 = vmul.f32 %v2648_v43, %v1995_v4 }
0x2a13   :  { %v2000_v44 = vpop.permute.xlu1 %1999 }
0x2a14   :  { %v2002_v45 = vmul.f32 %v2648_v43, %v2000_v44 }
0x2a16   :  { %2004 = vrot.lane.b32.xlu0 %v2002_v45, %s2782_s28 }
0x2a1a   :  { %2045 = vrot.lane.b32.xlu0 %v3201_v13, %s2782_s28 }
0x2a1e   :  { %1046 = vrot.lane.b32.xlu0 %v3116_v60, %s2782_s28  ;;  %v2034_v60 = vld [vmem:[%s3306_s9 + $0x10] sm:$0xff]  ;;  %s2793_s9 = smov [#allocation10]  }
0x2a1f   :  { %2500 = vmatprep.subr.mxu0 %v2034_v60  ;;  %s2137_s24 = sshll.u32 %s2793_s9, 4  ;;  %s2138_s24 = int_to_ptr.vmem [resolvable:$true] %s2137_s24 }
0x2a20   :  { %2501 = vmatpush3.msra.mxu0 %v2034_v60  ;;  %s2731_s2 = scalar_lea.vmem %s2138_s24, 64  ;;  %p2736_p7 = scmp.lt.s32.totalorder %s2138_s24, %s2138_s24 }
0x2a21   :  { %2502 = vmatprep.subr.mxu0 %v2033_v52  ;;  %p2732_p6 = scmp.ne.s32.totalorder %s2138_s24, %s2731_s2  ;;  %p2737_p8 = scmp.lt.s32.totalorder %s2731_s2, %s2731_s2 }
0x2a22   :  { %2503 = vmatpush3.msra.mxu0 %v2033_v52 }
0x2a23   :  { %2504 = vmatprep.subr.mxu0 %v2032_v53  ;;  %p2738_p9 = por %p2737_p8, %p2736_p7 }
0x2a24   :  { %2505 = vmatpush3.msra.mxu0 %v2032_v53 }
0x2a25   :  { %p2739_p10 = pnand %p2738_p9, %p2732_p6 }
0x2a88   :  { %v2005_v47 = vpop.permute.xlu0 %2004 }
0x2a89   :  { %v2007_v48 = vadd.f32 %v2005_v47, %v1997_v46 }
0x2a8b   :  { %2649 = vtanh.f32 %v2007_v48 }
0x2a8c   :  { %v2046_v49 = vpop.permute.xlu0 %2045 }
0x2a8d   :  { %2506 = vmatprep.mubr.msk.f32.mxu0 %vm198_vm3, %v2046_v49 }
0x2a90   :  { %v1047_v11 = vpop.permute.xlu0 %1046 }
0x2a91   :  { %1050 = vst.msk [vmem:[#allocation10 - $0x6] sm:$0xc0] %vm1049_vm6, %v1047_v11 }
0x2a98   :  { %v2650_v13 = vpop.eup %2649 }
0x2a99   :  { %2010 = vrot.lane.b32.xlu1 %v2650_v13, %s2791_s26 }
0x2b0b   :  { %v2011_v55 = vpop.permute.xlu1 %2010 }
0x2b0c   :  { %v2013_v57 = vmul.f32 %v2648_v43, %v2011_v55 }
0x2b0e   :  { %2015 = vrot.lane.b32.xlu0 %v2013_v57, %s2782_s28  ;;  %v2031_v54 = vsel %vm1059_vm5, %v2030_v32, %v2013_v57 }
0x2b0f   :  { %2047 = vrot.lane.b32.xlu1 %v2031_v54, %s2782_s28 }
0x2b13   :  { %1052 = vrot.lane.b32.xlu1 %v3072_v50, %s2792_s1 }
0x2b17   :  { %2021 = vrot.lane.b32.xlu1 %v2007_v48, %s2792_s1 }
0x2b80   :  { %v2016_v2 = vpop.permute.xlu0 %2015 }
0x2b81   :  { %2019 = vst.msk [vmem:[#allocation10 - $0x4] sm:$0xc0] %vm1049_vm6, %v2016_v2  ;;  %v2048_v59 = vpop.permute.xlu1 %2047 }
0x2b82   :  { %2507 = vmatmul.mubr.msk.f32.vlgmr.msra.gmra.mxu0 %vm198_vm3, %v2048_v59 }
0x2b85   :  { %v1053_v36 = vpop.permute.xlu1 %1052 }
0x2b86   :  { %1055 = vst.msk [vmem:[#allocation11 - $0x6] sm:$0xc0] %vm1049_vm6, %v1053_v36 }
0x2b89   :  { %v2022_v5 = vpop.permute.xlu1 %2021 }
0x2b8a   :  { %2025 = vst.msk [vmem:[#allocation11 - $0x4] sm:$0xc0] %vm1049_vm6, %v2022_v5 }
0x2b8b   :  { %2742 = shalt.err (!%p2739_p10)
}
0x2b8c   :  { %2143 = dma.vmem_to_hbm [thread:$0]  %s2138_s24, 64, %s3309_s12, [#allocation4], %s2782_s28, %s2782_s28, %s2783_s29  }
0x2b8d   :  { %s2751_s3 = scalar_lea.vmem %s2150_s7, 64  ;;  %p2756_p12 = scmp.lt.s32.totalorder %s2150_s7, %s2150_s7 }
0x2b8e   :  { %p2752_p11 = scmp.ne.s32.totalorder %s2150_s7, %s2751_s3  ;;  %p2757_p13 = scmp.lt.s32.totalorder %s2751_s3, %s2751_s3 }
0x2b90   :  { %p2758_p0 = por %p2757_p13, %p2756_p12 }
0x2b92   :  { %p2759_p1 = pnand %p2758_p0, %p2752_p11 }
0x2b94   :  { %2762 = shalt.err (!%p2759_p1)
}
0x2b95   :  { %2155 = dma.vmem_to_hbm [thread:$0]  %s2150_s7, 64, %s3310_s13, [#allocation12], %s2782_s28, %s2782_s28, %s2783_s29   ;;  %v2208_v50 = vld [vmem:[#allocation8] ss:$0 sm:$0xff] }
0x2c42   :  { %v2508_v61 = vpop.f32.mrf.mxu0 }
0x2c43   :  { %v2125_v56 = vadd.f32 %v2508_v61, %v2208_v50 }
0x2c44   :  { %v2119_v6 = vpop.f32.mrf.mxu0 }
0x2c45   :  { %2129 = vst.msk [vmem:[%s3308_s11 + $0x8] sm:$0xff] %vm110_vm2, %v2125_v56  ;;  %v2120_v0 = vadd.f32 %v2208_v50, %v2119_v6 }
0x2c47   :  { %2128 = vst.msk [vmem:[%s3308_s11] sm:$0xff] %vm110_vm2, %v2120_v0 }
0x2c48   :  { %2777 = dma.done.wait [#allocation4], 64  }
0x2c49   :  { %2778 = vsyncadd [#allocation4], 4294967232 }
0x2c4a   :  { %2779 = dma.done.wait [#allocation12], 64  }
0x2c4b   :  { %2780 = vsyncadd [#allocation12], 4294967232 }
0x2c4c   :  { %2164 = vsyncpa [#allocation3], 1 }
0x2c4d   :  { %2165 = vsyncpa [#allocation6], 1 }
0x2c4e   :  { %2166 = vsyncpa [#allocation9], 1 }
0x2c4f   :  { %2167 = vsyncpa [#allocation4], 1 }
0x2c50   :  { %2168 = vsyncpa [#allocation12], 1 }

</bundles_post_ra>
